<compile_context>
chip_gen: v7x
topology: tpu7x:2x2x1
jax: 0.10.0
libtpu: 0.0.40
codegen_flags: <defaults>
</compile_context>

<pallas_src>
import functools

import jax
import jax.numpy as jnp
from jax import lax
from jax.experimental import pallas as pl
from jax.experimental.pallas import tpu as pltpu

LANE = 128      # classifier output padded to a full lane width
SUBLANE = 8     # classifier output padded to a full sublane tile


# ----------------------------------------------------------------------------
# Fused kernel: one grid step == one graph
# ----------------------------------------------------------------------------
def _fused_pointnet_kernel(pos_ref, src_ref, dst_ref,
                           w1h_ref, w1p_ref, b1a_ref, w1b_ref, b1b_ref,
                           w2h_ref, w2p_ref, b2a_ref, w2b_ref, b2b_ref,
                           wc_ref, bc_ref,
                           out_ref, *, k):
    e = src_ref.shape[0]          # edges in this graph
    n = pos_ref.shape[0]          # nodes in this graph

    pos = pos_ref[...]            # [N, 3]
    src = src_ref[...]            # [E, 1] int32, graph-local source node ids
    dst = dst_ref[...]            # [E, 1] int32, graph-local target node ids

    # One-hot gather matrices built in VMEM from int indices (no dense masks
    # ever touch HBM); gathers run on the MXU, which is otherwise idle.
    node_iota = lax.broadcasted_iota(jnp.int32, (e, n), 1)
    g_src = (src == node_iota).astype(jnp.float32)                      # [E, N]
    g_dst = (dst == node_iota).astype(jnp.float32)                      # [E, N]

    pos_j = jnp.dot(g_src, pos, preferred_element_type=jnp.float32)     # [E, 3]
    pos_i = jnp.dot(g_dst, pos, preferred_element_type=jnp.float32)     # [E, 3]
    rel = pos_j - pos_i                                                  # [E, 3]

    def point_layer(h_j, w_h, w_p, b_a, w_b, b_b):
        # message MLP: Linear -> ReLU -> Linear, with the concat folded into
        # two matmuls:  cat([h_j, rel]) @ W  ==  h_j @ W[:C_in] + rel @ W[C_in:]
        t = (jnp.dot(h_j, w_h, preferred_element_type=jnp.float32)
             + jnp.dot(rel, w_p, preferred_element_type=jnp.float32)
             + b_a)
        t = jnp.maximum(t, 0.0)
        msg = jnp.dot(t, w_b, preferred_element_type=jnp.float32) + b_b  # [E, C]
        # segment max: edges are grouped by destination node (k per node, in
        # node order) -> reshape [E, C] to [N, k, C] and reduce the k axis.
        agg = jnp.max(msg.reshape(n, k, msg.shape[-1]), axis=1)          # [N, C]
        # fused outer h.relu() from PointNet.forward
        return jnp.maximum(agg, 0.0)

    # conv1: h == pos, so h_j == pos_j
    h1 = point_layer(pos_j, w1h_ref[...], w1p_ref[...], b1a_ref[...],
                     w1b_ref[...], b1b_ref[...])                         # [N, 32]

    # conv2: gather the VMEM-resident h1 for the source nodes
    h1_j = jnp.dot(g_src, h1, preferred_element_type=jnp.float32)        # [E, 32]
    h2 = point_layer(h1_j, w2h_ref[...], w2p_ref[...], b2a_ref[...],
                     w2b_ref[...], b2b_ref[...])                         # [N, 32]

    # global max pool over this graph's nodes, then classifier.
    pooled = jnp.max(h2, axis=0, keepdims=True)                          # [1, 32]
    pooled = jnp.broadcast_to(pooled, (SUBLANE, pooled.shape[-1]))       # [8, 32]
    out_ref[...] = (jnp.dot(pooled, wc_ref[...],
                            preferred_element_type=jnp.float32)
                    + bc_ref[...])                                       # [8, 128]


# ----------------------------------------------------------------------------
# Wrapper
# ----------------------------------------------------------------------------
def pointnet_forward(pos, edge_index, batch, params):
    """Fused PointNet forward. `batch` is implied by the regular structure
    (contiguous, equal-sized graphs) and is not re-read by the kernel."""
    del batch  # structure derived from num_graphs (see assumptions above)

    num_graphs = int(params["num_graphs"])
    n_nodes = pos.shape[0]
    n_per_g = n_nodes // num_graphs
    n_edges = edge_index.shape[1]
    e_per_g = n_edges // num_graphs
    k = e_per_g // n_per_g

    # Glue: convert global edge indices to per-graph local indices (int32 only,
    # no dense masks) and reshape per graph.
    src, dst = edge_index[0], edge_index[1]
    node_off = (dst // n_per_g) * n_per_g
    src_local = (src - node_off).astype(jnp.int32).reshape(num_graphs, e_per_g, 1)
    dst_local = (dst - node_off).astype(jnp.int32).reshape(num_graphs, e_per_g, 1)
    pos_g = pos.reshape(num_graphs, n_per_g, 3)

    # Pre-split the first Linear of each message MLP so the kernel avoids an
    # in-kernel concatenate of narrow (3-wide) feature blocks.
    c1_in = params["c1_w1"].shape[0] - 3
    c2_in = params["c2_w1"].shape[0] - 3
    w1h, w1p = params["c1_w1"][:c1_in], params["c1_w1"][c1_in:]
    w2h, w2p = params["c2_w1"][:c2_in], params["c2_w1"][c2_in:]

    # Lane-dense classifier output: pad num_classes up to 128 (sliced below).
    num_classes = params["cls_w"].shape[1]
    wc = jnp.pad(params["cls_w"], ((0, 0), (0, LANE - num_classes)))
    bc = jnp.pad(params["cls_b"], ((0, 0), (0, LANE - num_classes)))

    kernel = functools.partial(_fused_pointnet_kernel, k=k)

    def full_spec(arr):  # whole array, constant block index -> fetched once
        nd = arr.ndim
        return pl.BlockSpec(arr.shape, lambda g, _nd=nd: (0,) * _nd)

    out = pl.pallas_call(
        kernel,
        grid=(num_graphs,),
        out_shape=jax.ShapeDtypeStruct((num_graphs, SUBLANE, LANE), jnp.float32),
        in_specs=[
            pl.BlockSpec((None, n_per_g, 3), lambda g: (g, 0, 0)),   # pos
            pl.BlockSpec((None, e_per_g, 1), lambda g: (g, 0, 0)),   # src (local)
            pl.BlockSpec((None, e_per_g, 1), lambda g: (g, 0, 0)),   # dst (local)
            full_spec(w1h), full_spec(w1p), full_spec(params["c1_b1"]),
            full_spec(params["c1_w2"]), full_spec(params["c1_b2"]),
            full_spec(w2h), full_spec(w2p), full_spec(params["c2_b1"]),
            full_spec(params["c2_w2"]), full_spec(params["c2_b2"]),
            full_spec(wc), full_spec(bc),
        ],
        out_specs=pl.BlockSpec((None, SUBLANE, LANE), lambda g: (g, 0, 0)),
        compiler_params=pltpu.CompilerParams(
            dimension_semantics=("parallel",)),   # v7x: one graph per TC
    )(pos_g, src_local, dst_local,
      w1h, w1p, params["c1_b1"], params["c1_w2"], params["c1_b2"],
      w2h, w2p, params["c2_b1"], params["c2_w2"], params["c2_b2"],
      wc, bc)

    return out[:, 0, :num_classes]                                     # [B, 40]


# ----------------------------------------------------------------------------
# Deterministic parameter init (shapes from PointNet.__init__)
# ----------------------------------------------------------------------------
def init_params(key, hidden=32, num_classes=40, num_graphs=2):
    def linear(k, fan_in, fan_out):
        kw, kb = jax.random.split(k)
        scale = 1.0 / jnp.sqrt(jnp.float32(fan_in))
        w = jax.random.uniform(kw, (fan_in, fan_out), jnp.float32, -scale, scale)
        b = jax.random.uniform(kb, (1, fan_out), jnp.float32, -scale, scale)
        return w, b

    keys = jax.random.split(key, 5)
    c1_w1, c1_b1 = linear(keys[0], 3 + 3, hidden)        # conv1.mlp[0]: Linear(6, 32)
    c1_w2, c1_b2 = linear(keys[1], hidden, hidden)        # conv1.mlp[2]: Linear(32, 32)
    c2_w1, c2_b1 = linear(keys[2], hidden + 3, hidden)    # conv2.mlp[0]: Linear(35, 32)
    c2_w2, c2_b2 = linear(keys[3], hidden, hidden)        # conv2.mlp[2]: Linear(32, 32)
    cls_w, cls_b = linear(keys[4], hidden, num_classes)   # classifier: Linear(32, 40)
    return dict(c1_w1=c1_w1, c1_b1=c1_b1, c1_w2=c1_w2, c1_b2=c1_b2,
                c2_w1=c2_w1, c2_b1=c2_b1, c2_w2=c2_w2, c2_b2=c2_b2,
                cls_w=cls_w, cls_b=cls_b, num_graphs=num_graphs)


# ----------------------------------------------------------------------------
# Example inputs (small, deterministic; edges grouped by dst, fixed k)
# ----------------------------------------------------------------------------
def build_example(key, num_graphs=2, nodes_per_graph=16, k_neighbors=4):
    n_nodes = num_graphs * nodes_per_graph
    pos = jax.random.normal(key, (n_nodes, 3), jnp.float32)
    # Deterministic ring-style k-NN edges inside each graph, grouped by target
    # node (k incoming edges per node, node order) => segment max applies and
    # every node has incoming edges.
    srcs, dsts = [], []
    for i in range(n_nodes):
        base = (i // nodes_per_graph) * nodes_per_graph
        local = i - base
        for kk in range(1, k_neighbors + 1):
            srcs.append(base + (local + kk) % nodes_per_graph)  # j (source)
            dsts.append(i)                                      # i (target)
    edge_index = jnp.array([srcs, dsts], dtype=jnp.int32)        # [2, E], E = 128
    batch = jnp.repeat(jnp.arange(num_graphs, dtype=jnp.int32), nodes_per_graph)
    return pos, edge_index, batch


if __name__ == "__main__":
    key = jax.random.PRNGKey(0)
    k_in, k_par = jax.random.split(key)

    pos, edge_index, batch = build_example(k_in, num_graphs=2,
                                           nodes_per_graph=16, k_neighbors=4)
    params = init_params(k_par, hidden=32, num_classes=40, num_graphs=2)

    logits = pointnet_forward(pos, edge_index, batch, params)
    logits = jax.block_until_ready(logits)

    assert logits.shape == (2, 40), logits.shape
    assert jnp.all(jnp.isfinite(logits))
    print("KERNEL_OK")
</pallas_src>

<mosaic_0001>
module attributes {stable_mosaic.version = 11 : i64} {
  func.func @_fused_pointnet_kernel(%arg0: i32, %arg1: memref<1x16x3xf32, #tpu.memory_space<vmem>>, %arg2: memref<1x64x1xi32, #tpu.memory_space<vmem>>, %arg3: memref<1x64x1xi32, #tpu.memory_space<vmem>>, %arg4: memref<3x32xf32, #tpu.memory_space<vmem>>, %arg5: memref<3x32xf32, #tpu.memory_space<vmem>>, %arg6: memref<1x32xf32, #tpu.memory_space<vmem>>, %arg7: memref<32x32xf32, #tpu.memory_space<vmem>>, %arg8: memref<1x32xf32, #tpu.memory_space<vmem>>, %arg9: memref<32x32xf32, #tpu.memory_space<vmem>>, %arg10: memref<3x32xf32, #tpu.memory_space<vmem>>, %arg11: memref<1x32xf32, #tpu.memory_space<vmem>>, %arg12: memref<32x32xf32, #tpu.memory_space<vmem>>, %arg13: memref<1x32xf32, #tpu.memory_space<vmem>>, %arg14: memref<32x128xf32, #tpu.memory_space<vmem>>, %arg15: memref<1x128xf32, #tpu.memory_space<vmem>>, %arg16: memref<1x8x128xf32, #tpu.memory_space<vmem>>) attributes {dimension_semantics = [#tpu.dimension_semantics<parallel>], iteration_bounds = array<i64: 2>, scalar_prefetch = 0 : i64, scratch_operands = 0 : i64, tpu.core_type = #tpu.core_type<tc>, window_params = [{transform_indices = @transform_0, window_bounds = array<i64: 1, 16, 3>}, {transform_indices = @transform_1, window_bounds = array<i64: 1, 64, 1>}, {transform_indices = @transform_2, window_bounds = array<i64: 1, 64, 1>}, {pipeline_mode = #tpu.pipeline_mode<synchronous>, transform_indices = @transform_3, window_bounds = array<i64: 3, 32>}, {pipeline_mode = #tpu.pipeline_mode<synchronous>, transform_indices = @transform_4, window_bounds = array<i64: 3, 32>}, {pipeline_mode = #tpu.pipeline_mode<synchronous>, transform_indices = @transform_5, window_bounds = array<i64: 1, 32>}, {pipeline_mode = #tpu.pipeline_mode<synchronous>, transform_indices = @transform_6, window_bounds = array<i64: 32, 32>}, {pipeline_mode = #tpu.pipeline_mode<synchronous>, transform_indices = @transform_7, window_bounds = array<i64: 1, 32>}, {pipeline_mode = #tpu.pipeline_mode<synchronous>, transform_indices = @transform_8, window_bounds = array<i64: 32, 32>}, {pipeline_mode = #tpu.pipeline_mode<synchronous>, transform_indices = @transform_9, window_bounds = array<i64: 3, 32>}, {pipeline_mode = #tpu.pipeline_mode<synchronous>, transform_indices = @transform_10, window_bounds = array<i64: 1, 32>}, {pipeline_mode = #tpu.pipeline_mode<synchronous>, transform_indices = @transform_11, window_bounds = array<i64: 32, 32>}, {pipeline_mode = #tpu.pipeline_mode<synchronous>, transform_indices = @transform_12, window_bounds = array<i64: 1, 32>}, {pipeline_mode = #tpu.pipeline_mode<synchronous>, transform_indices = @transform_13, window_bounds = array<i64: 32, 128>}, {pipeline_mode = #tpu.pipeline_mode<synchronous>, transform_indices = @transform_14, window_bounds = array<i64: 1, 128>}, {transform_indices = @transform_15, window_bounds = array<i64: 1, 8, 128>}]} {
    %c0 = arith.constant 0 : index
    %c0_0 = arith.constant 0 : index
    %c0_1 = arith.constant 0 : index
    %0 = vector.load %arg1[%c0, %c0_0, %c0_1] : memref<1x16x3xf32, #tpu.memory_space<vmem>>, vector<1x16x3xf32>
    %1 = vector.shape_cast %0 : vector<1x16x3xf32> to vector<16x3xf32>
    %c0_2 = arith.constant 0 : index
    %c0_3 = arith.constant 0 : index
    %c0_4 = arith.constant 0 : index
    %2 = vector.load %arg2[%c0_2, %c0_3, %c0_4] : memref<1x64x1xi32, #tpu.memory_space<vmem>>, vector<1x64x1xi32>
    %3 = vector.shape_cast %2 : vector<1x64x1xi32> to vector<64x1xi32>
    %c0_5 = arith.constant 0 : index
    %c0_6 = arith.constant 0 : index
    %c0_7 = arith.constant 0 : index
    %4 = vector.load %arg3[%c0_5, %c0_6, %c0_7] : memref<1x64x1xi32, #tpu.memory_space<vmem>>, vector<1x64x1xi32>
    %5 = vector.shape_cast %4 : vector<1x64x1xi32> to vector<64x1xi32>
    %6 = tpu.iota {dimensions = array<i32: 1>} : vector<64x16xi32>
    %7 = vector.broadcast %3 : vector<64x1xi32> to vector<64x16xi32>
    %8 = arith.cmpi eq, %7, %6 : vector<64x16xi32>
    %9 = arith.extui %8 : vector<64x16xi1> to vector<64x16xi32>
    %10 = arith.sitofp %9 : vector<64x16xi32> to vector<64x16xf32>
    %11 = vector.broadcast %5 : vector<64x1xi32> to vector<64x16xi32>
    %12 = arith.cmpi eq, %11, %6 : vector<64x16xi32>
    %13 = arith.extui %12 : vector<64x16xi1> to vector<64x16xi32>
    %14 = arith.sitofp %13 : vector<64x16xi32> to vector<64x16xf32>
    %cst = arith.constant dense<0.000000e+00> : vector<64x3xf32>
    %15 = tpu.matmul %10, %1, %cst {dimension_numbers = #tpu.dot_dimension_numbers<[1], [0], [0], [1], [0, 0, 1, 1], [], []>} : vector<64x16xf32>, vector<16x3xf32>, vector<64x3xf32> -> vector<64x3xf32>
    %cst_8 = arith.constant dense<0.000000e+00> : vector<64x3xf32>
    %16 = tpu.matmul %14, %1, %cst_8 {dimension_numbers = #tpu.dot_dimension_numbers<[1], [0], [0], [1], [0, 0, 1, 1], [], []>} : vector<64x16xf32>, vector<16x3xf32>, vector<64x3xf32> -> vector<64x3xf32>
    %17 = arith.subf %15, %16 : vector<64x3xf32>
    %c0_9 = arith.constant 0 : index
    %c0_10 = arith.constant 0 : index
    %18 = vector.load %arg4[%c0_9, %c0_10] : memref<3x32xf32, #tpu.memory_space<vmem>>, vector<3x32xf32>
    %c0_11 = arith.constant 0 : index
    %c0_12 = arith.constant 0 : index
    %19 = vector.load %arg5[%c0_11, %c0_12] : memref<3x32xf32, #tpu.memory_space<vmem>>, vector<3x32xf32>
    %c0_13 = arith.constant 0 : index
    %c0_14 = arith.constant 0 : index
    %20 = vector.load %arg6[%c0_13, %c0_14] : memref<1x32xf32, #tpu.memory_space<vmem>>, vector<1x32xf32>
    %c0_15 = arith.constant 0 : index
    %c0_16 = arith.constant 0 : index
    %21 = vector.load %arg7[%c0_15, %c0_16] : memref<32x32xf32, #tpu.memory_space<vmem>>, vector<32x32xf32>
    %c0_17 = arith.constant 0 : index
    %c0_18 = arith.constant 0 : index
    %22 = vector.load %arg8[%c0_17, %c0_18] : memref<1x32xf32, #tpu.memory_space<vmem>>, vector<1x32xf32>
    %cst_19 = arith.constant dense<0.000000e+00> : vector<64x32xf32>
    %23 = tpu.matmul %15, %18, %cst_19 {dimension_numbers = #tpu.dot_dimension_numbers<[1], [0], [0], [1], [0, 0, 1, 1], [], []>} : vector<64x3xf32>, vector<3x32xf32>, vector<64x32xf32> -> vector<64x32xf32>
    %cst_20 = arith.constant dense<0.000000e+00> : vector<64x32xf32>
    %24 = tpu.matmul %17, %19, %cst_20 {dimension_numbers = #tpu.dot_dimension_numbers<[1], [0], [0], [1], [0, 0, 1, 1], [], []>} : vector<64x3xf32>, vector<3x32xf32>, vector<64x32xf32> -> vector<64x32xf32>
    %25 = arith.addf %23, %24 : vector<64x32xf32>
    %26 = vector.broadcast %20 : vector<1x32xf32> to vector<64x32xf32>
    %27 = arith.addf %25, %26 : vector<64x32xf32>
    %cst_21 = arith.constant 0.000000e+00 : f32
    %28 = vector.broadcast %cst_21 : f32 to vector<64x32xf32>
    %29 = arith.maximumf %27, %28 : vector<64x32xf32>
    %cst_22 = arith.constant dense<0.000000e+00> : vector<64x32xf32>
    %30 = tpu.matmul %29, %21, %cst_22 {dimension_numbers = #tpu.dot_dimension_numbers<[1], [0], [0], [1], [0, 0, 1, 1], [], []>} : vector<64x32xf32>, vector<32x32xf32>, vector<64x32xf32> -> vector<64x32xf32>
    %31 = vector.broadcast %22 : vector<1x32xf32> to vector<64x32xf32>
    %32 = arith.addf %30, %31 : vector<64x32xf32>
    %33 = vector.shape_cast %32 : vector<64x32xf32> to vector<16x4x32xf32>
    %cst_23 = arith.constant dense<0xFF800000> : vector<16x32xf32>
    %34 = vector.multi_reduction <maximumf>, %33, %cst_23 [1] : vector<16x4x32xf32> to vector<16x32xf32>
    %cst_24 = arith.constant 0.000000e+00 : f32
    %35 = vector.broadcast %cst_24 : f32 to vector<16x32xf32>
    %36 = arith.maximumf %34, %35 : vector<16x32xf32>
    %cst_25 = arith.constant dense<0.000000e+00> : vector<64x32xf32>
    %37 = tpu.matmul %10, %36, %cst_25 {dimension_numbers = #tpu.dot_dimension_numbers<[1], [0], [0], [1], [0, 0, 1, 1], [], []>} : vector<64x16xf32>, vector<16x32xf32>, vector<64x32xf32> -> vector<64x32xf32>
    %c0_26 = arith.constant 0 : index
    %c0_27 = arith.constant 0 : index
    %38 = vector.load %arg9[%c0_26, %c0_27] : memref<32x32xf32, #tpu.memory_space<vmem>>, vector<32x32xf32>
    %c0_28 = arith.constant 0 : index
    %c0_29 = arith.constant 0 : index
    %39 = vector.load %arg10[%c0_28, %c0_29] : memref<3x32xf32, #tpu.memory_space<vmem>>, vector<3x32xf32>
    %c0_30 = arith.constant 0 : index
    %c0_31 = arith.constant 0 : index
    %40 = vector.load %arg11[%c0_30, %c0_31] : memref<1x32xf32, #tpu.memory_space<vmem>>, vector<1x32xf32>
    %c0_32 = arith.constant 0 : index
    %c0_33 = arith.constant 0 : index
    %41 = vector.load %arg12[%c0_32, %c0_33] : memref<32x32xf32, #tpu.memory_space<vmem>>, vector<32x32xf32>
    %c0_34 = arith.constant 0 : index
    %c0_35 = arith.constant 0 : index
    %42 = vector.load %arg13[%c0_34, %c0_35] : memref<1x32xf32, #tpu.memory_space<vmem>>, vector<1x32xf32>
    %cst_36 = arith.constant dense<0.000000e+00> : vector<64x32xf32>
    %43 = tpu.matmul %37, %38, %cst_36 {dimension_numbers = #tpu.dot_dimension_numbers<[1], [0], [0], [1], [0, 0, 1, 1], [], []>} : vector<64x32xf32>, vector<32x32xf32>, vector<64x32xf32> -> vector<64x32xf32>
    %cst_37 = arith.constant dense<0.000000e+00> : vector<64x32xf32>
    %44 = tpu.matmul %17, %39, %cst_37 {dimension_numbers = #tpu.dot_dimension_numbers<[1], [0], [0], [1], [0, 0, 1, 1], [], []>} : vector<64x3xf32>, vector<3x32xf32>, vector<64x32xf32> -> vector<64x32xf32>
    %45 = arith.addf %43, %44 : vector<64x32xf32>
    %46 = vector.broadcast %40 : vector<1x32xf32> to vector<64x32xf32>
    %47 = arith.addf %45, %46 : vector<64x32xf32>
    %cst_38 = arith.constant 0.000000e+00 : f32
    %48 = vector.broadcast %cst_38 : f32 to vector<64x32xf32>
    %49 = arith.maximumf %47, %48 : vector<64x32xf32>
    %cst_39 = arith.constant dense<0.000000e+00> : vector<64x32xf32>
    %50 = tpu.matmul %49, %41, %cst_39 {dimension_numbers = #tpu.dot_dimension_numbers<[1], [0], [0], [1], [0, 0, 1, 1], [], []>} : vector<64x32xf32>, vector<32x32xf32>, vector<64x32xf32> -> vector<64x32xf32>
    %51 = vector.broadcast %42 : vector<1x32xf32> to vector<64x32xf32>
    %52 = arith.addf %50, %51 : vector<64x32xf32>
    %53 = vector.shape_cast %52 : vector<64x32xf32> to vector<16x4x32xf32>
    %cst_40 = arith.constant dense<0xFF800000> : vector<16x32xf32>
    %54 = vector.multi_reduction <maximumf>, %53, %cst_40 [1] : vector<16x4x32xf32> to vector<16x32xf32>
    %cst_41 = arith.constant 0.000000e+00 : f32
    %55 = vector.broadcast %cst_41 : f32 to vector<16x32xf32>
    %56 = arith.maximumf %54, %55 : vector<16x32xf32>
    %cst_42 = arith.constant dense<0xFF800000> : vector<32xf32>
    %57 = vector.multi_reduction <maximumf>, %56, %cst_42 [0] : vector<16x32xf32> to vector<32xf32>
    %58 = vector.shape_cast %57 : vector<32xf32> to vector<1x32xf32>
    %59 = vector.shape_cast %58 : vector<1x32xf32> to vector<1x32xf32>
    %60 = vector.broadcast %59 : vector<1x32xf32> to vector<8x32xf32>
    %c0_43 = arith.constant 0 : index
    %c0_44 = arith.constant 0 : index
    %61 = vector.load %arg14[%c0_43, %c0_44] : memref<32x128xf32, #tpu.memory_space<vmem>>, vector<32x128xf32>
    %cst_45 = arith.constant dense<0.000000e+00> : vector<8x128xf32>
    %62 = tpu.matmul %60, %61, %cst_45 {dimension_numbers = #tpu.dot_dimension_numbers<[1], [0], [0], [1], [0, 0, 1, 1], [], []>} : vector<8x32xf32>, vector<32x128xf32>, vector<8x128xf32> -> vector<8x128xf32>
    %c0_46 = arith.constant 0 : index
    %c0_47 = arith.constant 0 : index
    %63 = vector.load %arg15[%c0_46, %c0_47] : memref<1x128xf32, #tpu.memory_space<vmem>>, vector<1x128xf32>
    %64 = vector.broadcast %63 : vector<1x128xf32> to vector<8x128xf32>
    %65 = arith.addf %62, %64 : vector<8x128xf32>
    %c0_48 = arith.constant 0 : index
    %c0_49 = arith.constant 0 : index
    %c0_50 = arith.constant 0 : index
    %66 = vector.load %arg16[%c0_48, %c0_49, %c0_50] : memref<1x8x128xf32, #tpu.memory_space<vmem>>, vector<1x8x128xf32>
    %67 = vector.shape_cast %66 : vector<1x8x128xf32> to vector<8x128xf32>
    %68 = vector.shape_cast %65 : vector<8x128xf32> to vector<1x8x128xf32>
    tpu.vector_store %arg16[%c0_48, %c0_49, %c0_50], %68 {strides = array<i32>} : memref<1x8x128xf32, #tpu.memory_space<vmem>>, vector<1x8x128xf32>,
    return
  }
  func.func @transform_0(%arg0: i32) -> (i32, i32, i32) {
    %c0_i32 = arith.constant 0 : i32
    %c0_i32_0 = arith.constant 0 : i32
    %c0_i32_1 = arith.constant 0 : i32
    return %arg0, %c0_i32, %c0_i32_0 : i32, i32, i32
  }
  func.func @transform_1(%arg0: i32) -> (i32, i32, i32) {
    %c0_i32 = arith.constant 0 : i32
    %c0_i32_0 = arith.constant 0 : i32
    %c0_i32_1 = arith.constant 0 : i32
    return %arg0, %c0_i32, %c0_i32_0 : i32, i32, i32
  }
  func.func @transform_2(%arg0: i32) -> (i32, i32, i32) {
    %c0_i32 = arith.constant 0 : i32
    %c0_i32_0 = arith.constant 0 : i32
    %c0_i32_1 = arith.constant 0 : i32
    return %arg0, %c0_i32, %c0_i32_0 : i32, i32, i32
  }
  func.func @transform_3(%arg0: i32) -> (i32, i32) {
    %c0_i32 = arith.constant 0 : i32
    %c0_i32_0 = arith.constant 0 : i32
    %c0_i32_1 = arith.constant 0 : i32
    return %c0_i32, %c0_i32_0 : i32, i32
  }
  func.func @transform_4(%arg0: i32) -> (i32, i32) {
    %c0_i32 = arith.constant 0 : i32
    %c0_i32_0 = arith.constant 0 : i32
    %c0_i32_1 = arith.constant 0 : i32
    return %c0_i32, %c0_i32_0 : i32, i32
  }
  func.func @transform_5(%arg0: i32) -> (i32, i32) {
    %c0_i32 = arith.constant 0 : i32
    %c0_i32_0 = arith.constant 0 : i32
    %c0_i32_1 = arith.constant 0 : i32
    return %c0_i32, %c0_i32_0 : i32, i32
  }
  func.func @transform_6(%arg0: i32) -> (i32, i32) {
    %c0_i32 = arith.constant 0 : i32
    %c0_i32_0 = arith.constant 0 : i32
    %c0_i32_1 = arith.constant 0 : i32
    return %c0_i32, %c0_i32_0 : i32, i32
  }
  func.func @transform_7(%arg0: i32) -> (i32, i32) {
    %c0_i32 = arith.constant 0 : i32
    %c0_i32_0 = arith.constant 0 : i32
    %c0_i32_1 = arith.constant 0 : i32
    return %c0_i32, %c0_i32_0 : i32, i32
  }
  func.func @transform_8(%arg0: i32) -> (i32, i32) {
    %c0_i32 = arith.constant 0 : i32
    %c0_i32_0 = arith.constant 0 : i32
    %c0_i32_1 = arith.constant 0 : i32
    return %c0_i32, %c0_i32_0 : i32, i32
  }
  func.func @transform_9(%arg0: i32) -> (i32, i32) {
    %c0_i32 = arith.constant 0 : i32
    %c0_i32_0 = arith.constant 0 : i32
    %c0_i32_1 = arith.constant 0 : i32
    return %c0_i32, %c0_i32_0 : i32, i32
  }
  func.func @transform_10(%arg0: i32) -> (i32, i32) {
    %c0_i32 = arith.constant 0 : i32
    %c0_i32_0 = arith.constant 0 : i32
    %c0_i32_1 = arith.constant 0 : i32
    return %c0_i32, %c0_i32_0 : i32, i32
  }
  func.func @transform_11(%arg0: i32) -> (i32, i32) {
    %c0_i32 = arith.constant 0 : i32
    %c0_i32_0 = arith.constant 0 : i32
    %c0_i32_1 = arith.constant 0 : i32
    return %c0_i32, %c0_i32_0 : i32, i32
  }
  func.func @transform_12(%arg0: i32) -> (i32, i32) {
    %c0_i32 = arith.constant 0 : i32
    %c0_i32_0 = arith.constant 0 : i32
    %c0_i32_1 = arith.constant 0 : i32
    return %c0_i32, %c0_i32_0 : i32, i32
  }
  func.func @transform_13(%arg0: i32) -> (i32, i32) {
    %c0_i32 = arith.constant 0 : i32
    %c0_i32_0 = arith.constant 0 : i32
    %c0_i32_1 = arith.constant 0 : i32
    return %c0_i32, %c0_i32_0 : i32, i32
  }
  func.func @transform_14(%arg0: i32) -> (i32, i32) {
    %c0_i32 = arith.constant 0 : i32
    %c0_i32_0 = arith.constant 0 : i32
    %c0_i32_1 = arith.constant 0 : i32
    return %c0_i32, %c0_i32_0 : i32, i32
  }
  func.func @transform_15(%arg0: i32) -> (i32, i32, i32) {
    %c0_i32 = arith.constant 0 : i32
    %c0_i32_0 = arith.constant 0 : i32
    %c0_i32_1 = arith.constant 0 : i32
    return %arg0, %c0_i32, %c0_i32_0 : i32, i32, i32
  }
}

</mosaic_0001>

<bundles_post_ra>
// kernel: tpu_custom_call.1
= control target key start
LH: loop header
LB: loop body
LE: loop exit
PB: predicated region body
PF: predicated region fallthrough
CT: control target
= control target key end

     0   :  { %s3510_s0 = inlined_call_operand.vmem [shape: f32[2,16,3], index: 0, kind: input, shape index: {}]   ;;  %s3511_s1 = inlined_call_operand.vmem [shape: s32[2,64,1], index: 1, kind: input, shape index: {}]   ;;  %s3512_s2 = inlined_call_operand.vmem [shape: s32[2,64,1], index: 2, kind: input, shape index: {}]   ;;  %s3513_s3 = inlined_call_operand.vmem [shape: f32[3,32], index: 3, kind: input, shape index: {}]   ;;  %s3514_s4 = inlined_call_operand.vmem [shape: f32[3,32], index: 4, kind: input, shape index: {}]   ;;  %s3515_s5 = inlined_call_operand.vmem [shape: f32[1,32], index: 5, kind: input, shape index: {}]   ;;  %s3516_s6 = inlined_call_operand.vmem [shape: f32[32,32], index: 6, kind: input, shape index: {}]   ;;  %s3517_s7 = inlined_call_operand.vmem [shape: f32[1,32], index: 7, kind: input, shape index: {}]   ;;  %s3518_s8 = inlined_call_operand.vmem [shape: f32[32,32], index: 8, kind: input, shape index: {}]   ;;  %s3519_s9 = inlined_call_operand.vmem [shape: f32[3,32], index: 9, kind: input, shape index: {}]   ;;  %s3520_s10 = inlined_call_operand.vmem [shape: f32[1,32], index: 10, kind: input, shape index: {}]   ;;  %s3521_s11 = inlined_call_operand.vmem [shape: f32[32,32], index: 11, kind: input, shape index: {}]   ;;  %s3522_s12 = inlined_call_operand.vmem [shape: f32[1,32], index: 12, kind: input, shape index: {}]   ;;  %s3523_s13 = inlined_call_operand.vmem [shape: f32[32,128], index: 13, kind: input, shape index: {}]   ;;  %s3524_s14 = inlined_call_operand.vmem [shape: f32[1,128], index: 14, kind: input, shape index: {}]   ;;  %s3525_s15 = inlined_call_operand.hbm [shape: f32[2,8,128], index: 15, kind: output, shape index: {}]  }
   0x1   :  { %3529 = sst [smem:[#allocation8_spill]] %s3510_s0 }
   0x2   :  { %3530 = sst [smem:[#allocation9_spill]] %s3511_s1 }
   0x3   :  { %20 = vsyncpa [#allocation3], 0 }
   0x4   :  { %22 = vsyncpa [#allocation3 + $0x1], 0  ;;  %s3043_s18 = smov 0   ;;  %s3045_s19 = smov 0  }
   0x5   :  { %s3047_s20 = smov 0   ;;  %s3049_s21 = smov 0  }
   0x6 LB: > { %3531 = sst [smem:[#allocation5_spill]] %s2952_s20  ;;  %s3064_s22 = sadd.s32 4294967295, %s2956_s21   ;;  %s2956_s21 = sphi %s3049_s21, %s3538_s21   ;;  %s2952_s20 = sphi %s3047_s20, %s3540_s20   ;;  %s2948_s19 = sphi %s3045_s19, %s3542_s19   ;;  %s2944_s18 = sphi %s3043_s18, %s3541_s18  }
   0x7   : > { %s2415_s23 = sadd.s32 4294967294, %s2956_s21   ;;  %s3068_s24 = sadd.s32 1, %s2956_s21  }
   0x8   : > { %3532 = sst [smem:[#allocation6_spill]] %s3068_s24  ;;  %s365_s25 = sadd.s32 1, %s2952_s20 }
   0x9   : > { %s362_s26 = ssub.s32 %s2956_s21, %s3068_s24  ;;  %p375_p0 = scmp.ne.s32.totalorder %s2952_s20, %s2948_s19 }
   0xa   : > { %p363_p1 = scmp.eq.s32.totalorder %s362_s26, 0  ;;  %p376_p2 = scmp.eq.s32.totalorder %s3064_s22, 1 }
   0xb   : > { %p381_p3 = scmp.ne.s32.totalorder %s2948_s19, %s2944_s18  ;;  %p382_p4 = scmp.eq.s32.totalorder %s2415_s23, 1 }
   0xc   : > { %s3079_s27 = scalar_select %p363_p1, %s2952_s20, %s365_s25  }
   0xd   : > { %p3081_p5 = por %p376_p2, %p375_p0  ;;  %p3085_p6 = por %p382_p4, %p381_p3 }
   0xe   : > { %3533 = sst [smem:[#allocation7_spill]] %s3079_s27  ;;  %p2418_p7 = scmp.ge.s32.totalorder %s2956_s21, 1 }
   0xf   : > { %p460_p8 = scmp.lt.s32.totalorder %s2956_s21, 3 }
  0x11   : > { %p461_p9 = pnand %p2418_p7, %p460_p8 }
  0x12   : > { %p518_p10 = scmp.lt.s32.totalorder (!%p461_p9), %s3064_s22, 1  ;;  %v2958_v0 = vmov (!%p461_p9), 0   ;;  %s3536_s1 = sld [smem:[#allocation9_spill]] (!%p461_p9)  ;;  %v551_v20 = vlaneseq (!%p461_p9)  ;;  %vm649_vm0 = vcmask (!%p461_p9), 130048   ;;  %v2959_v24 = vmov (!%p461_p9), 0.0   ;;  %v919_v57 = vld [vmem:[%s3516_s6] sm:$0xff] (!%p461_p9) }
  0x13   : > { %464 = sbr.rel (%p461_p9) target bundleno = 1820 (0x71c), region = 80  ;;  %2893 = vset.pattern.permute.xlu1 (!%p461_p9), %v2958_v0  ;;  %2892 = vset.pattern.permute.xlu0 (!%p461_p9), %v2958_v0  ;;  %s3537_s0 = sld [smem:[#allocation8_spill]] (!%p461_p9)  ;;  %v917_v55 = vld [vmem:[%s3514_s4] sm:$0x7] (!%p461_p9)  ;;  %v920_v58 = vld [vmem:[%s3516_s6 + $0x8] sm:$0xff] (!%p461_p9) }
  0x14   : > { %v3122_v21 = vand.u32 (!%p461_p9), 127, %v551_v20  ;;  %v916_v56 = vld [vmem:[%s3513_s3] sm:$0x7] (!%p461_p9)  ;;  %v2797_v59 = vpack.c.bf16 (!%p461_p9), %v920_v58, %v919_v57  ;;  %s515_s27 = sand.u32 (!%p461_p9), 1, %s2948_s19  }
  0x15   : > { %v1645_v58 = vld [vmem:[%s3518_s8] sm:$0xff] (!%p461_p9) }
  0x1a   : > { %s519_s30 = scalar_select %p518_p10, %s3064_s22, 1 }
  0x1c   : > { %s2528_s16 = sshll.u32 %s519_s30, 6  ;;  %s2527_s17 = sshll.u32 %s519_s30, 4 }
  0x1d   : > { %s3096_s26 = scalar_lea.vmem %s3536_s1, %s2528_s16  ;;  %s3101_s24 = scalar_lea.vmem %s3512_s2, %s2528_s16 }
  0x1e   : > { %v541_v1 = vld [vmem:[%s3096_s26 + $0x30] sm:$0xff]  ;;  %v535_v2 = vld [vmem:[%s3096_s26] sm:$0xff]  ;;  %v542_v3 = vld [vmem:[%s3096_s26 + $0x38] sm:$0xff]  ;;  %s522_s20 = scalar_lea.vmem %s3537_s0, %s2527_s17  ;;  %s2419_s16 = sshll.u32 %s515_s27, 3 }
  0x1f   : > { %572 = vperm.xlu0 %2892, %v541_v1   ;;  %554 = vperm.xlu1 %2893, %v535_v2   ;;  %v543_v4 = vld [vmem:[%s3101_s24] sm:$0xff]  ;;  %v534_v6 = vld [vmem:[%s522_s20 + $0x8] sm:$0xff]  ;;  %v537_v10 = vld [vmem:[%s3096_s26 + $0x10] sm:$0xff]  ;;  %s517_s30 = scalar_lea.vmem [#allocation2], %s2419_s16  ;;  %s2319_s1 = scalar_lea.sflag [#allocation3], %s515_s27 }
  0x20   : > { %v533_v5 = vld [vmem:[%s522_s20] sm:$0xff]  ;;  %v536_v7 = vld [vmem:[%s3096_s26 + $0x8] sm:$0xff]  ;;  %v545_v11 = vld [vmem:[%s3101_s24 + $0x10] sm:$0xff]  ;;  %s2332_s23 = sshll.u32 %s517_s30, 4  ;;  %s3470_s23 = int_to_ptr.vmem [resolvable:$true] %s2332_s23 }
  0x21   : > { %v544_v8 = vld [vmem:[%s3101_s24 + $0x8] sm:$0xff]  ;;  %v2789_v9 = vpack.c.bf16 %v534_v6, %v533_v5  ;;  %v538_v12 = vld [vmem:[%s3096_s26 + $0x18] sm:$0xff]  ;;  %v539_v14 = vld [vmem:[%s3096_s26 + $0x20] sm:$0xff]  ;;  %s2894_s17 = scalar_lea.vmem %s3470_s23, 128 }
  0x22   : > { %v546_v13 = vld [vmem:[%s3101_s24 + $0x18] sm:$0xff]  ;;  %v547_v15 = vld [vmem:[%s3101_s24 + $0x20] sm:$0xff]  ;;  %v540_v16 = vld [vmem:[%s3096_s26 + $0x28] sm:$0xff]  ;;  %s2524_s26 = sshll.u32 %s3064_s22, 7  ;;  %p2895_p11 = scmp.ne.s32.totalorder %s3470_s23, %s2894_s17 }
  0x23   : > { %575 = vperm.xlu0 %2892, %v542_v3   ;;  %602 = vperm.xlu1 %2893, %v543_v4   ;;  %v548_v17 = vld [vmem:[%s3101_s24 + $0x28] sm:$0xff]  ;;  %v549_v18 = vld [vmem:[%s3101_s24 + $0x30] sm:$0xff]  ;;  %v550_v19 = vld [vmem:[%s3101_s24 + $0x38] sm:$0xff]  ;;  %s3468_s0 = scalar_lea.hbm %s3525_s15, %s2524_s26  ;;  %s2962_s22 = smov [#allocation2]  }
  0x24   : > { %2831 = vmatprep.subr.bf16.mxu1 %v2789_v9  ;;  %2790 = vmatprep.subr.bf16.mxu0 %v2789_v9  ;;  %v1649_v4 = vld [vmem:[%s3519_s9] sm:$0x7]  ;;  %p2896_p12 = pnand %p2895_p11, %p3081_p5  ;;  %s2898_s16 = sshll.u32 %s2962_s22, 4  ;;  %s2899_s16 = int_to_ptr.vmem [resolvable:$false] %s2898_s16 }
  0x25   : > { %2832 = vmatpush3.bf16.msra.mxu1 %v2789_v9  ;;  %2792 = vmatpush3.bf16.msra.mxu0 %v2789_v9  ;;  %s2900_s25 = scalar_lea.vmem %s2899_s16, 256  ;;  %p2901_p0 = scmp.lt.s32.totalorder %s3470_s23, %s2899_s16 }
  0x26   : > { %2794 = vmatprep.subr.bf16.mxu1 %v2789_v9  ;;  %p2897_p13 = pneg %p2896_p12  ;;  %p2902_p1 = scmp.lt.s32.totalorder %s2900_s25, %s2894_s17 }
  0x27   : > { %557 = vperm.xlu0 %2892, %v536_v7   ;;  %605 = vperm.xlu1 %2893, %v544_v8  }
  0x28   : > { %p2903_p2 = por %p2902_p1, %p2901_p0 }
  0x2a   : > { %p2904_p3 = pnand %p2903_p2, %p2897_p13 }
  0x2b   : > { %560 = vperm.xlu0 %2892, %v537_v10   ;;  %608 = vperm.xlu1 %2893, %v545_v11  }
  0x2f   : > { %563 = vperm.xlu0 %2892, %v538_v12   ;;  %611 = vperm.xlu1 %2893, %v546_v13  }
  0x33   : > { %566 = vperm.xlu0 %2892, %v539_v14   ;;  %614 = vperm.xlu1 %2893, %v547_v15  }
  0x37   : > { %569 = vperm.xlu0 %2892, %v540_v16   ;;  %617 = vperm.xlu1 %2893, %v548_v17  }
  0x3b   : > { %620 = vperm.xlu0 %2892, %v549_v18   ;;  %623 = vperm.xlu1 %2893, %v550_v19  }
  0x9e   : > { %v573_v22 = vpop.permute.xlu0 %572  ;;  %v555_v23 = vpop.permute.xlu1 %554 }
  0x9f   : > { %vm583_vm1 = vcmp.eq.s32.totalorder %v573_v22, %v3122_v21  ;;  %vm577_vm2 = vcmp.eq.s32.totalorder %v555_v23, %v3122_v21  ;;  %v922_v22 = vld [vmem:[%s3516_s6 + $0x18] sm:$0xff] }
  0xa0   : > { %v3127_v25 = vsel %vm583_vm1, 1.0, %v2959_v24  ;;  %v3130_v26 = vsel %vm577_vm2, 1.0, %v2959_v24  ;;  %vm949_vm2 = vcmask 1042432  }
  0xa1   : > { %2641 = vmatprep.mubr.msk.f32.mxu1 %vm649_vm0, %v3127_v25  ;;  %2632 = vmatprep.mubr.msk.f32.mxu0 %vm649_vm0, %v3130_v26 }
  0xa2   : > { %v576_v27 = vpop.permute.xlu0 %575  ;;  %v603_v28 = vpop.permute.xlu1 %602  ;;  %2660 = vmatprep.subr.msk.mxu0 %vm949_vm2, %v917_v55 }
  0xa3   : > { %vm584_vm3 = vcmp.eq.s32.totalorder %v576_v27, %v3122_v21  ;;  %vm625_vm4 = vcmp.eq.s32.totalorder %v603_v28, %v3122_v21  ;;  %v2476_v27 = vld [vmem:[%s3515_s5] ss:$0 sm:$0xff] }
  0xa4   : > { %v3139_v29 = vsel %vm584_vm3, 1.0, %v2959_v24  ;;  %v2434_v30 = vsel %vm625_vm4, 1.0, %v2959_v24  ;;  %vm924_vm3 = vcmask 23552   ;;  %vm1218_vm4 = vcmask 261120  }
  0xa5   : > { %2642 = vmatmul.mubr.msk.f32.vlgmr.msra.gmra.mrb[0].mxu1 %vm649_vm0, %v3139_v29 }
  0xa6   : > { %v558_v31 = vpop.permute.xlu0 %557  ;;  %v606_v32 = vpop.permute.xlu1 %605  ;;  %2796 = vmatpush3.bf16.msra.mxu1 %v2789_v9  ;;  %2648 = vmatprep.mubr.msk.f32.mxu1 %vm649_vm0, %v2434_v30 }
  0xa7   : > { %vm578_vm5 = vcmp.eq.s32.totalorder %v558_v31, %v3122_v21  ;;  %vm626_vm6 = vcmp.eq.s32.totalorder %v606_v32, %v3122_v21  ;;  %2798 = vmatprep.subr.bf16.mxu1 %v2797_v59 }
  0xa8   : > { %v3148_v33 = vsel %vm578_vm5, 1.0, %v2959_v24  ;;  %v2435_v34 = vsel %vm626_vm6, 1.0, %v2959_v24  ;;  %vm1372_vm5 = vcmask 257024   ;;  %vm1517_vm6 = vcmask 1041409  }
  0xa9   : > { %2633 = vmatmul.mubr.msk.f32.vlgmr.msra.gmra.mrb[0].mxu0 %vm649_vm0, %v3148_v33  ;;  %2649 = vmatmul.mubr.msk.f32.vlgmr.msra.gmra.mrb[2].mxu1 %vm649_vm0, %v2435_v34 }
  0xaa   : > { %v561_v35 = vpop.permute.xlu0 %560  ;;  %v609_v36 = vpop.permute.xlu1 %608  ;;  %2661 = vmatpush3.msk.msra.mxu0 %vm949_vm2, %v917_v55  ;;  %2800 = vmatpush3.bf16.msra.mxu1 %v2797_v59  ;;  %v1646_v59 = vld [vmem:[%s3518_s8 + $0x8] sm:$0xff] }
  0xab   : > { %vm579_vm7 = vcmp.eq.s32.totalorder %v561_v35, %v3122_v21  ;;  %vm627_vm8 = vcmp.eq.s32.totalorder %v609_v36, %v3122_v21  ;;  %2674 = vmatprep.subr.msk.mxu0 %vm949_vm2, %v916_v56 }
  0xac   : > { %v3157_v37 = vsel %vm579_vm7, 1.0, %v2959_v24  ;;  %v2436_v38 = vsel %vm627_vm8, 1.0, %v2959_v24  ;;  %vm1519_vm7 = vcmask 1042434   ;;  %vm1521_vm8 = vcmask 1043459  }
  0xad   : > { %2635 = vmatprep.mubr.msk.f32.mxu0 %vm649_vm0, %v3157_v37  ;;  %2651 = vmatprep.mubr.msk.f32.mxu1 %vm649_vm0, %v2436_v38 }
  0xae   : > { %v564_v39 = vpop.permute.xlu0 %563  ;;  %v612_v40 = vpop.permute.xlu1 %611 }
  0xaf   : > { %vm580_vm9 = vcmp.eq.s32.totalorder %v564_v39, %v3122_v21  ;;  %vm628_vm10 = vcmp.eq.s32.totalorder %v612_v40, %v3122_v21 }
  0xb0   : > { %v3166_v41 = vsel %vm580_vm9, 1.0, %v2959_v24  ;;  %v2437_v42 = vsel %vm628_vm10, 1.0, %v2959_v24  ;;  %vm1523_vm9 = vcmask 1044484   ;;  %vm1525_vm10 = vcmask 1045509  }
  0xb1   : > { %2636 = vmatmul.mubr.msk.f32.gmra.mrb[2].mxu0 %vm649_vm0, %v3166_v41  ;;  %2652 = vmatmul.mubr.msk.f32.gmra.mrb[4].mxu1 %vm649_vm0, %v2437_v42 }
  0xb2   : > { %v567_v43 = vpop.permute.xlu0 %566  ;;  %v615_v44 = vpop.permute.xlu1 %614 }
  0xb3   : > { %vm581_vm11 = vcmp.eq.s32.totalorder %v567_v43, %v3122_v21  ;;  %vm629_vm12 = vcmp.eq.s32.totalorder %v615_v44, %v3122_v21 }
  0xb4   : > { %v3175_v45 = vsel %vm581_vm11, 1.0, %v2959_v24  ;;  %v2438_v46 = vsel %vm629_vm12, 1.0, %v2959_v24  ;;  %vm1527_vm11 = vcmask 1046534   ;;  %vm1529_vm12 = vcmask 1047559  }
  0xb5   : > { %2638 = vmatprep.mubr.msk.f32.mxu0 %vm649_vm0, %v3175_v45  ;;  %2654 = vmatprep.mubr.msk.f32.mxu1 %vm649_vm0, %v2438_v46 }
  0xb6   : > { %v570_v47 = vpop.permute.xlu0 %569  ;;  %v618_v48 = vpop.permute.xlu1 %617 }
  0xb7   : > { %vm582_vm13 = vcmp.eq.s32.totalorder %v570_v47, %v3122_v21  ;;  %vm630_vm14 = vcmp.eq.s32.totalorder %v618_v48, %v3122_v21 }
  0xb8   : > { %v3184_v49 = vsel %vm582_vm13, 1.0, %v2959_v24  ;;  %v2439_v50 = vsel %vm630_vm14, 1.0, %v2959_v24 }
  0xb9   : > { %2639 = vmatmul.mubr.msk.f32.gmra.mrb[4].mxu0 %vm649_vm0, %v3184_v49  ;;  %2655 = vmatmul.mubr.msk.f32.gmra.mrb[6].mxu1 %vm649_vm0, %v2439_v50 }
  0xba   : > { %v621_v51 = vpop.permute.xlu0 %620  ;;  %v624_v52 = vpop.permute.xlu1 %623 }
  0xbb   : > { %vm631_vm15 = vcmp.eq.s32.totalorder %v621_v51, %v3122_v21  ;;  %vm632_vm1 = vcmp.eq.s32.totalorder %v624_v52, %v3122_v21  ;;  %v921_v21 = vld [vmem:[%s3516_s6 + $0x10] sm:$0xff] }
  0xbc   : > { %v2440_v53 = vsel %vm631_vm15, 1.0, %v2959_v24  ;;  %v2441_v54 = vsel %vm632_vm1, 1.0, %v2959_v24  ;;  %v2801_v23 = vpack.c.bf16 %v922_v22, %v921_v21 }
  0xbd   : > { %2657 = vmatprep.mubr.msk.f32.mxu1 %vm649_vm0, %v2440_v53 }
  0xbe   : > { %2658 = vmatmul.mubr.msk.f32.gmra.mrb[8].mxu1 %vm649_vm0, %v2441_v54  ;;  %2802 = vmatprep.subr.bf16.mxu1 %v2801_v23 }
  0xbf   : > { %2804 = vmatpush3.bf16.msra.mxu1 %v2801_v23 }
 0x178   : > { %v2643_v60 = vpop.f32.mrb[0].mxu1 }
 0x179   : > { %v770_v61 = vpop.f32.mrb[1].mxu1 }
 0x17c   : > { %v2634_v62 = vpop.f32.mrb[0].mxu0  ;;  %v2650_v63 = vpop.f32.mrb[2].mxu1 }
 0x17d   : > { %v909_v0 = vsub.f32 %v2634_v62, %v2650_v63  ;;  %v740_v1 = vpop.f32.mrb[1].mxu0  ;;  %v869_v2 = vpop.f32.mrb[3].mxu1 }
 0x17e   : > { %v908_v3 = vsub.f32 %v740_v1, %v869_v2 }
 0x180   : > { %2662 = vmatprep.mubr.msk.f32.mxu0 %vm924_vm3, %v908_v3 }
 0x181   : > { %2663 = vmatmul.mubr.msk.f32.vlgmr.msra.gmra.mrb[6].mxu0 %vm924_vm3, %v909_v0 }
 0x182   : > { %2675 = vmatpush3.msk.msra.mxu0 %vm949_vm2, %v916_v56 }
 0x183   : > { %2724 = vmatprep.subr.msk.mxu0 %vm949_vm2, %v1649_v4 }
 0x184   : > { %v2637_v5 = vpop.f32.mrb[2].mxu0  ;;  %v2653_v6 = vpop.f32.mrb[4].mxu1 }
 0x185   : > { %v911_v7 = vsub.f32 %v2637_v5, %v2653_v6  ;;  %v750_v8 = vpop.f32.mrb[3].mxu0  ;;  %v879_v9 = vpop.f32.mrb[5].mxu1 }
 0x186   : > { %v910_v10 = vsub.f32 %v750_v8, %v879_v9 }
 0x188   : > { %2665 = vmatprep.mubr.msk.f32.mxu0 %vm924_vm3, %v910_v10 }
 0x189   : > { %2666 = vmatmul.mubr.msk.f32.gmra.mrb[8].mxu0 %vm924_vm3, %v911_v7 }
 0x18c   : > { %v2640_v11 = vpop.f32.mrb[4].mxu0  ;;  %v2656_v12 = vpop.f32.mrb[6].mxu1 }
 0x18d   : > { %v913_v13 = vsub.f32 %v2640_v11, %v2656_v12  ;;  %v760_v14 = vpop.f32.mrb[5].mxu0  ;;  %v889_v15 = vpop.f32.mrb[7].mxu1 }
 0x18e   : > { %v912_v16 = vsub.f32 %v760_v14, %v889_v15 }
 0x190   : > { %2668 = vmatprep.mubr.msk.f32.mxu0 %vm924_vm3, %v912_v16 }
 0x191   : > { %v2659_v17 = vpop.f32.mrb[8].mxu1  ;;  %2669 = vmatmul.mubr.msk.f32.gmra.mrb[10].mxu0 %vm924_vm3, %v913_v13 }
 0x192   : > { %v915_v18 = vsub.f32 %v2643_v60, %v2659_v17  ;;  %v899_v19 = vpop.f32.mrb[9].mxu1 }
 0x193   : > { %v914_v20 = vsub.f32 %v770_v61, %v899_v19 }
 0x195   : > { %2671 = vmatprep.mubr.msk.f32.mxu0 %vm924_vm3, %v914_v20 }
 0x196   : > { %2672 = vmatmul.mubr.msk.f32.gmra.mrb[12].mxu0 %vm924_vm3, %v915_v18 }
 0x197   : > { %2676 = vmatprep.mubr.msk.f32.mxu0 %vm924_vm3, %v740_v1 }
 0x19a   : > { %2677 = vmatmul.mubr.msk.f32.vlgmr.msra.gmra.mrb[6].mxu0 %vm924_vm3, %v2634_v62  ;;  %v1648_v62 = vld [vmem:[%s3518_s8 + $0x18] sm:$0xff] }
 0x19b   : > { %2679 = vmatprep.mubr.msk.f32.mxu0 %vm924_vm3, %v750_v8  ;;  %2725 = vmatpush3.msk.msra.mxu0 %vm949_vm2, %v1649_v4 }
 0x19e   : > { %2680 = vmatmul.mubr.msk.f32.gmra.mrb[8].mxu0 %vm924_vm3, %v2637_v5 }
 0x19f   : > { %2682 = vmatprep.mubr.msk.f32.mxu0 %vm924_vm3, %v760_v14 }
 0x1a2   : > { %2683 = vmatmul.mubr.msk.f32.gmra.mrb[10].mxu0 %vm924_vm3, %v2640_v11 }
 0x1a3   : > { %2685 = vmatprep.mubr.msk.f32.mxu0 %vm924_vm3, %v770_v61  ;;  %v2809_v61 = vpack.c.bf16 %v1646_v59, %v1645_v58 }
 0x1a5   : > { %2810 = vmatprep.subr.bf16.mxu0 %v2809_v61 }
 0x1a6   : > { %2686 = vmatmul.mubr.msk.f32.gmra.mrb[12].mxu0 %vm924_vm3, %v2643_v60  ;;  %v1647_v60 = vld [vmem:[%s3518_s8 + $0x10] sm:$0xff] }
 0x1a7   : > { %2726 = vmatprep.mubr.msk.f32.mxu0 %vm924_vm3, %v908_v3  ;;  %v2813_v63 = vpack.c.bf16 %v1648_v62, %v1647_v60 }
 0x1aa   : > { %2727 = vmatmul.mubr.msk.f32.vlgmr.msra.gmra.mrb[14].mxu0 %vm924_vm3, %v909_v0 }
 0x1ab   : > { %2729 = vmatprep.mubr.msk.f32.mxu0 %vm924_vm3, %v910_v10  ;;  %2812 = vmatpush3.bf16.msra.mxu0 %v2809_v61 }
 0x1ac   : > { %2814 = vmatprep.subr.bf16.mxu0 %v2813_v63 }
 0x1ae   : > { %2730 = vmatmul.mubr.msk.f32.gmra.mrb[16].mxu0 %vm924_vm3, %v911_v7 }
 0x1af   : > { %2732 = vmatprep.mubr.msk.f32.mxu0 %vm924_vm3, %v912_v16  ;;  %2816 = vmatpush3.bf16.msra.mxu0 %v2813_v63 }
 0x1b2   : > { %2733 = vmatmul.mubr.msk.f32.gmra.mrb[18].mxu0 %vm924_vm3, %v913_v13 }
 0x1b3   : > { %2735 = vmatprep.mubr.msk.f32.mxu0 %vm924_vm3, %v914_v20 }
 0x1b6   : > { %2736 = vmatmul.mubr.msk.f32.gmra.mrb[20].mxu0 %vm924_vm3, %v915_v18 }
 0x26d   : > { %v2678_v28 = vpop.f32.mrb[6].mxu0 }
 0x26e   : > { %v1197_v30 = vadd.f32 %v2678_v28, %v2476_v27  ;;  %v1151_v31 = vpop.f32.mrb[7].mxu0 }
 0x26f   : > { %v1196_v32 = vadd.f32 %v2476_v27, %v1151_v31 }
 0x270   : > { %v1205_v36 = vmax.f32 %v1197_v30, 0.0 }
 0x271   : > { %v1204_v34 = vmax.f32 %v1196_v32, 0.0  ;;  %v2681_v35 = vpop.f32.mrb[8].mxu0 }
 0x272   : > { %v1199_v38 = vadd.f32 %v2681_v35, %v2476_v27  ;;  %v1161_v39 = vpop.f32.mrb[9].mxu0 }
 0x273   : > { %v1198_v40 = vadd.f32 %v2476_v27, %v1161_v39  ;;  %2696 = vmatprep.mubr.msk.f32.mxu1 %vm1218_vm4, %v1204_v34 }
 0x274   : > { %2697 = vmatmul.mubr.msk.f32.vlgmr.msra.gmra.mrb[10].mxu1 %vm1218_vm4, %v1205_v36  ;;  %v1207_v44 = vmax.f32 %v1199_v38, 0.0 }
 0x275   : > { %v1206_v42 = vmax.f32 %v1198_v40, 0.0  ;;  %v2684_v43 = vpop.f32.mrb[10].mxu0 }
 0x276   : > { %v1201_v46 = vadd.f32 %v2684_v43, %v2476_v27  ;;  %v1171_v47 = vpop.f32.mrb[11].mxu0 }
 0x277   : > { %v1200_v48 = vadd.f32 %v2476_v27, %v1171_v47  ;;  %2699 = vmatprep.mubr.msk.f32.mxu1 %vm1218_vm4, %v1206_v42 }
 0x278   : > { %2700 = vmatmul.mubr.msk.f32.gmra.mrb[12].mxu1 %vm1218_vm4, %v1207_v44  ;;  %v1209_v52 = vmax.f32 %v1201_v46, 0.0 }
 0x279   : > { %v1208_v50 = vmax.f32 %v1200_v48, 0.0  ;;  %v2687_v51 = vpop.f32.mrb[12].mxu0 }
 0x27a   : > { %v1203_v53 = vadd.f32 %v2687_v51, %v2476_v27  ;;  %v1181_v54 = vpop.f32.mrb[13].mxu0 }
 0x27b   : > { %v1202_v55 = vadd.f32 %v2476_v27, %v1181_v54  ;;  %2702 = vmatprep.mubr.msk.f32.mxu1 %vm1218_vm4, %v1208_v50 }
 0x27c   : > { %2703 = vmatmul.mubr.msk.f32.gmra.mrb[14].mxu1 %vm1218_vm4, %v1209_v52  ;;  %v1211_v57 = vmax.f32 %v1203_v53, 0.0 }
 0x27d   : > { %v1210_v56 = vmax.f32 %v1202_v55, 0.0 }
 0x27f   : > { %2705 = vmatprep.mubr.msk.f32.mxu1 %vm1218_vm4, %v1210_v56 }
 0x280   : > { %2706 = vmatmul.mubr.msk.f32.gmra.mrb[16].mxu1 %vm1218_vm4, %v1211_v57 }
 0x281   : > { %2712 = vmatprep.mubr.msk.f32.mxu1 %vm649_vm0, %v3130_v26  ;;  %v3275_v26 = vld [vmem:[%s3517_s7] ss:$0 sm:$0xff] }
 0x347   : > { %v2698_v0 = vpop.f32.mrb[10].mxu1 }
 0x348   : > { %v1315_v1 = vadd.f32 %v2698_v0, %v3275_v26  ;;  %v1309_v2 = vpop.f32.mrb[11].mxu1 }
 0x349   : > { %v1310_v3 = vadd.f32 %v3275_v26, %v1309_v2 }
 0x34a   : > { %v1357_v4 = vcombine.high %v1315_v1, %v1315_v1  ;;  %v1387_v5 = vsel %vm1372_vm5, %v1315_v1, -inf }
 0x34b   : > { %v1388_v6 = vrot.slane %v1387_v5, 4  ;;  %v1356_v7 = vcombine.high %v1310_v3, %v1310_v3  ;;  %v1373_v8 = vsel %vm1372_vm5, %v1310_v3, -inf  ;;  %v2701_v9 = vpop.f32.mrb[12].mxu1 }
 0x34c   : > { %v1394_v10 = vsel %vm1372_vm5, %v1357_v4, -inf  ;;  %v1374_v11 = vrot.slane %v1373_v8, 4  ;;  %v1325_v12 = vadd.f32 %v2701_v9, %v3275_v26  ;;  %v1319_v13 = vpop.f32.mrb[13].mxu1 }
 0x34d   : > { %v1389_v14 = vmax.f32 %v1387_v5, %v1388_v6  ;;  %v1395_v15 = vrot.slane %v1394_v10, 4  ;;  %v1380_v16 = vsel %vm1372_vm5, %v1356_v7, -inf  ;;  %v1320_v17 = vadd.f32 %v3275_v26, %v1319_v13 }
 0x34e   : > { %v1375_v18 = vmax.f32 %v1373_v8, %v1374_v11  ;;  %v1381_v19 = vrot.slane %v1380_v16, 4  ;;  %v1359_v20 = vcombine.high %v1325_v12, %v1325_v12  ;;  %v1415_v21 = vsel %vm1372_vm5, %v1325_v12, -inf }
 0x34f   : > { %v1390_v22 = vrot.slane %v1389_v14, 2  ;;  %v1396_v23 = vmax.f32 %v1394_v10, %v1395_v15  ;;  %v1416_v27 = vrot.slane %v1415_v21, 4  ;;  %v1358_v28 = vcombine.high %v1320_v17, %v1320_v17  ;;  %v2704_v30 = vpop.f32.mrb[14].mxu1 }
 0x350   : > { %v1376_v31 = vrot.slane %v1375_v18, 2  ;;  %v1382_v32 = vmax.f32 %v1380_v16, %v1381_v19  ;;  %v1422_v34 = vsel %vm1372_vm5, %v1359_v20, -inf  ;;  %v1401_v35 = vsel %vm1372_vm5, %v1320_v17, -inf  ;;  %v1329_v36 = vpop.f32.mrb[15].mxu1 }
 0x351   : > { %v1391_v38 = vmax.f32 %v1389_v14, %v1390_v22  ;;  %v1397_v39 = vrot.slane %v1396_v23, 2  ;;  %v1417_v40 = vmax.f32 %v1415_v21, %v1416_v27  ;;  %v1423_v42 = vrot.slane %v1422_v34, 4 }
 0x352   : > { %v1377_v43 = vmax.f32 %v1375_v18, %v1376_v31  ;;  %v1383_v44 = vrot.slane %v1382_v32, 2  ;;  %v1402_v46 = vrot.slane %v1401_v35, 4  ;;  %v1408_v47 = vsel %vm1372_vm5, %v1358_v28, -inf }
 0x353   : > { %v1392_v48 = vrot.slane %v1391_v38, 1  ;;  %v1398_v50 = vmax.f32 %v1396_v23, %v1397_v39  ;;  %v1418_v51 = vrot.slane %v1417_v40, 2  ;;  %v1424_v52 = vmax.f32 %v1422_v34, %v1423_v42  ;;  %v2707_v53 = vpop.f32.mrb[16].mxu1 }
 0x354   : > { %v1378_v54 = vrot.slane %v1377_v43, 1  ;;  %v1384_v55 = vmax.f32 %v1382_v32, %v1383_v44  ;;  %v1403_v56 = vmax.f32 %v1401_v35, %v1402_v46  ;;  %v1409_v57 = vrot.slane %v1408_v47, 4  ;;  %v1339_v58 = vpop.f32.mrb[17].mxu1 }
 0x355   : > { %v1399_v59 = vrot.slane %v1398_v50, 1  ;;  %v1419_v60 = vmax.f32 %v1417_v40, %v1418_v51  ;;  %v1425_v61 = vrot.slane %v1424_v52, 2  ;;  %v1393_v2 = vmax.f32 %v1391_v38, %v1392_v48 }
 0x356   : > { %v1379_v62 = vmax.f32 %v1377_v43, %v1378_v54  ;;  %v1385_v63 = vrot.slane %v1384_v55, 1  ;;  %v1404_v0 = vrot.slane %v1403_v56, 2  ;;  %v1410_v1 = vmax.f32 %v1408_v47, %v1409_v57 }
 0x357   : > { %v3289_v3 = vmax.f32 %v1398_v50, %v1399_v59  ;;  %v1426_v4 = vmax.f32 %v1424_v52, %v1425_v61  ;;  %v1420_v6 = vrot.slane %v1419_v60, 1  ;;  %v1335_v10 = vadd.f32 %v2704_v30, %v3275_v26 }
 0x358   : > { %v1386_v5 = vmax.f32 %v1384_v55, %v1385_v63  ;;  %v1405_v7 = vmax.f32 %v1403_v56, %v1404_v0  ;;  %v1411_v8 = vrot.slane %v1410_v1, 2  ;;  %v1485_v9 = vmax.f32 %v1379_v62, 0.0 }
 0x359   : > { %v1427_v12 = vrot.slane %v1426_v4, 1  ;;  %v1330_v14 = vadd.f32 %v3275_v26, %v1329_v36  ;;  %v1487_v15 = vmax.f32 %v1393_v2, 0.0  ;;  %v1488_v16 = vmax.f32 %v3289_v3, 0.0 }
 0x35a   : > { %v1486_v11 = vmax.f32 %v1386_v5, 0.0  ;;  %v1406_v13 = vrot.slane %v1405_v7, 1  ;;  %v1361_v17 = vcombine.high %v1335_v10, %v1335_v10  ;;  %v1443_v18 = vsel %vm1372_vm5, %v1335_v10, -inf }
 0x35b   : > { %v3296_v20 = vmax.f32 %v1419_v60, %v1420_v6  ;;  %v1412_v21 = vmax.f32 %v1410_v1, %v1411_v8  ;;  %v1444_v22 = vrot.slane %v1443_v18, 4  ;;  %v1360_v28 = vcombine.high %v1330_v14, %v1330_v14 }
 0x35c   : > { %v1518_v19 = vsel %vm1517_vm6, %v1486_v11, %v1485_v9  ;;  %v1450_v27 = vsel %vm1372_vm5, %v1361_v17, -inf  ;;  %v1429_v30 = vsel %vm1372_vm5, %v1330_v14, -inf  ;;  %v3303_v31 = vmax.f32 %v1426_v4, %v1427_v12 }
 0x35d   : > { %v3299_v23 = vsel %vm1519_vm7, %v1487_v15, %v1518_v19  ;;  %v3305_v32 = vmax.f32 %v1405_v7, %v1406_v13  ;;  %v1445_v34 = vmax.f32 %v1443_v18, %v1444_v22  ;;  %v1451_v35 = vrot.slane %v1450_v27, 4 }
 0x35e   : > { %v1430_v36 = vrot.slane %v1429_v30, 4  ;;  %v1436_v38 = vsel %vm1372_vm5, %v1360_v28, -inf  ;;  %v1345_v39 = vadd.f32 %v2707_v53, %v3275_v26  ;;  %v1340_v40 = vadd.f32 %v3275_v26, %v1339_v58 }
 0x35f   : > { %v1413_v42 = vrot.slane %v1412_v21, 1  ;;  %v1446_v43 = vrot.slane %v1445_v34, 2  ;;  %v1452_v44 = vmax.f32 %v1450_v27, %v1451_v35  ;;  %v1437_v46 = vrot.slane %v1436_v38, 4 }
 0x360   : > { %v1431_v47 = vmax.f32 %v1429_v30, %v1430_v36  ;;  %v1363_v48 = vcombine.high %v1345_v39, %v1345_v39  ;;  %v1471_v50 = vsel %vm1372_vm5, %v1345_v39, -inf  ;;  %v1362_v51 = vcombine.high %v1340_v40, %v1340_v40 }
 0x361   : > { %v1447_v52 = vmax.f32 %v1445_v34, %v1446_v43  ;;  %v1453_v54 = vrot.slane %v1452_v44, 2  ;;  %v1438_v55 = vmax.f32 %v1436_v38, %v1437_v46  ;;  %v1472_v56 = vrot.slane %v1471_v50, 4 }
 0x362   : > { %v1432_v57 = vrot.slane %v1431_v47, 2  ;;  %v1478_v53 = vsel %vm1372_vm5, %v1363_v48, -inf  ;;  %v1457_v26 = vsel %vm1372_vm5, %v1340_v40, -inf  ;;  %v1464_v58 = vsel %vm1372_vm5, %v1362_v51, -inf }
 0x363   : > { %v1448_v59 = vrot.slane %v1447_v52, 1  ;;  %v1454_v60 = vmax.f32 %v1452_v44, %v1453_v54  ;;  %v1439_v61 = vrot.slane %v1438_v55, 2  ;;  %v1473_v62 = vmax.f32 %v1471_v50, %v1472_v56 }
 0x364   : > { %v1433_v63 = vmax.f32 %v1431_v47, %v1432_v57  ;;  %v1479_v0 = vrot.slane %v1478_v53, 4  ;;  %v1458_v1 = vrot.slane %v1457_v26, 4  ;;  %v1465_v2 = vrot.slane %v1464_v58, 4 }
 0x365   : > { %v1414_v4 = vmax.f32 %v1412_v21, %v1413_v42  ;;  %v1455_v5 = vrot.slane %v1454_v60, 1  ;;  %v1440_v6 = vmax.f32 %v1438_v55, %v1439_v61  ;;  %v1474_v7 = vrot.slane %v1473_v62, 2 }
 0x366   : > { %v1434_v8 = vrot.slane %v1433_v63, 1  ;;  %v1480_v9 = vmax.f32 %v1478_v53, %v1479_v0  ;;  %v1459_v10 = vmax.f32 %v1457_v26, %v1458_v1  ;;  %v1466_v11 = vmax.f32 %v1464_v58, %v1465_v2 }
 0x367   : > { %v1489_v12 = vmax.f32 %v3305_v32, 0.0  ;;  %v1449_v13 = vmax.f32 %v1447_v52, %v1448_v59  ;;  %v1441_v14 = vrot.slane %v1440_v6, 1  ;;  %v1475_v15 = vmax.f32 %v1473_v62, %v1474_v7 }
 0x368   : > { %v1435_v17 = vmax.f32 %v1433_v63, %v1434_v8  ;;  %v1481_v18 = vrot.slane %v1480_v9, 2  ;;  %v1460_v19 = vrot.slane %v1459_v10, 2  ;;  %v1467_v22 = vrot.slane %v1466_v11, 2  ;;  %v2511_v8 = vld [vmem:[%s3520_s10] ss:$0 sm:$0xff] }
 0x369   : > { %v1491_v27 = vmax.f32 %v3296_v20, 0.0  ;;  %v1490_v21 = vmax.f32 %v1414_v4, 0.0  ;;  %v1456_v28 = vmax.f32 %v1454_v60, %v1455_v5  ;;  %v1442_v30 = vmax.f32 %v1440_v6, %v1441_v14  ;;  %v1653_v5 = vld [vmem:[%s3521_s11 + $0x10] sm:$0xff]  ;;  %v1654_v6 = vld [vmem:[%s3521_s11 + $0x18] sm:$0xff] }
 0x36a   : > { %v1476_v34 = vrot.slane %v1475_v15, 1  ;;  %v1482_v35 = vmax.f32 %v1480_v9, %v1481_v18  ;;  %v1461_v36 = vmax.f32 %v1459_v10, %v1460_v19  ;;  %v1468_v38 = vmax.f32 %v1466_v11, %v1467_v22 }
 0x36b   : > { %v1495_v39 = vmax.f32 %v1449_v13, 0.0  ;;  %v1493_v40 = vmax.f32 %v1435_v17, 0.0  ;;  %v1494_v42 = vmax.f32 %v1442_v30, 0.0  ;;  %v1522_v32 = vsel %vm1521_vm8, %v1488_v16, %v3299_v23 }
 0x36c   : > { %v1483_v43 = vrot.slane %v1482_v35, 1  ;;  %v1462_v44 = vrot.slane %v1461_v36, 1  ;;  %v1469_v46 = vrot.slane %v1468_v38, 1  ;;  %v1524_v20 = vsel %vm1523_vm9, %v1489_v12, %v1522_v32 }
 0x36d   : > { %v1496_v47 = vmax.f32 %v1456_v28, 0.0  ;;  %v1531_v48 = vsel %vm1517_vm6, %v1494_v42, %v1493_v40  ;;  %v1492_v50 = vmax.f32 %v3303_v31, 0.0  ;;  %v1526_v51 = vsel %vm1525_vm10, %v1490_v21, %v1524_v20 }
 0x36e   : > { %v1532_v52 = vsel %vm1519_vm7, %v1495_v39, %v1531_v48  ;;  %v1477_v54 = vmax.f32 %v1475_v15, %v1476_v34  ;;  %v1463_v55 = vmax.f32 %v1461_v36, %v1462_v44  ;;  %v1470_v56 = vmax.f32 %v1468_v38, %v1469_v46  ;;  %v2233_v44 = vld [vmem:[%s3523_s13] sm:$0xff]  ;;  %v2234_v46 = vld [vmem:[%s3523_s13 + $0x8] sm:$0xff]  ;;  %v2235_v48 = vld [vmem:[%s3523_s13 + $0x10] sm:$0xff] }
 0x36f   : > { %v1484_v3 = vmax.f32 %v1482_v35, %v1483_v43  ;;  %v1528_v16 = vsel %vm1527_vm11, %v1491_v27, %v1526_v51  ;;  %v1533_v23 = vsel %vm1521_vm8, %v1496_v47, %v1532_v52  ;;  %v2821_v7 = vpack.c.bf16 %v1654_v6, %v1653_v5  ;;  %v3393_v52 = vld [vmem:[%s3522_s12] ss:$0 sm:$0xff] }
 0x370   : > { %v1497_v57 = vmax.f32 %v1463_v55, 0.0  ;;  %v1498_v53 = vmax.f32 %v1470_v56, 0.0  ;;  %v1530_v26 = vsel %vm1529_vm12, %v1492_v50, %v1528_v16  ;;  %v1499_v58 = vmax.f32 %v1477_v54, 0.0  ;;  %v2236_v50 = vld [vmem:[%s3523_s13 + $0x18] sm:$0xff] }
 0x371   : > { %v1500_v31 = vmax.f32 %v1484_v3, 0.0  ;;  %v2826_v20 = vpack.c.bf16 %v2234_v46, %v2233_v44  ;;  %v2960_v47 = vmov 0.0|0.0   ;;  %v2829_v51 = vpack.c.bf16 %v2236_v50, %v2235_v48 }
 0x372   : > { %v1534_v59 = vsel %vm1523_vm9, %v1497_v57, %v1533_v23 }
 0x373   : > { %v1535_v60 = vsel %vm1525_vm10, %v1498_v53, %v1534_v59 }
 0x374   : > { %v1536_v61 = vsel %vm1527_vm11, %v1499_v58, %v1535_v60 }
 0x375   : > { %v1537_v62 = vsel %vm1529_vm12, %v1500_v31, %v1536_v61 }
 0x376   : > { %v2805_v63 = vpack.c.bf16 %v1537_v62, %v1530_v26 }
 0x378   : > { %2806 = vmatprep.subr.bf16.mxu1 %v2805_v63 }
 0x379   : > { %2808 = vmatpush3.bf16.msra.mxu1 %v2805_v63 }
 0x37c   : > { %2713 = vmatmul.mubr.msk.f32.vlgmr.msra.gmra.mrb[18].mxu1 %vm649_vm0, %v3148_v33  ;;  %v1651_v33 = vld [vmem:[%s3521_s11] sm:$0xff] }
 0x37d   : > { %2715 = vmatprep.mubr.msk.f32.mxu1 %vm649_vm0, %v3157_v37  ;;  %v1652_v37 = vld [vmem:[%s3521_s11 + $0x8] sm:$0xff] }
 0x380   : > { %2716 = vmatmul.mubr.msk.f32.gmra.mrb[20].mxu1 %vm649_vm0, %v3166_v41  ;;  %v2817_v41 = vpack.c.bf16 %v1652_v37, %v1651_v33 }
 0x381   : > { %2718 = vmatprep.mubr.msk.f32.mxu1 %vm649_vm0, %v3175_v45 }
 0x382   : > { %2818 = vmatprep.subr.bf16.mxu1 %v2817_v41 }
 0x383   : > { %2820 = vmatpush3.bf16.msra.mxu1 %v2817_v41 }
 0x384   : > { %2719 = vmatmul.mubr.msk.f32.gmra.mrb[22].mxu1 %vm649_vm0, %v3184_v49  ;;  %2822 = vmatprep.subr.bf16.mxu1 %v2821_v7 }
 0x385   : > { %2721 = vmatprep.mubr.msk.f32.mxu1 %vm649_vm0, %v3127_v25 }
 0x387   : > { %2824 = vmatpush3.bf16.msra.mxu1 %v2821_v7 }
 0x388   : > { %2722 = vmatmul.mubr.msk.f32.gmra.mrb[24].mxu1 %vm649_vm0, %v3139_v29  ;;  %2825 = vmatprep.subr.bf16.mxu1 %v2960_v47  ;;  %vm2961_vm0 = vmmov 0  }
 0x44f   : > { %v2714_v45 = vpop.f32.mrb[18].mxu1 }
 0x450   : > { %v1606_v0 = vpop.f32.mrb[19].mxu1 }
 0x451   : > { %2746 = vmatprep.mubr.msk.f32.mxu0 %vm1218_vm4, %v1606_v0 }
 0x452   : > { %2747 = vmatmul.mubr.msk.f32.vlgmr.msra.gmra.mrb[14].mxu0 %vm1218_vm4, %v2714_v45 }
 0x453   : > { %v2717_v25 = vpop.f32.mrb[20].mxu1 }
 0x454   : > { %v1616_v49 = vpop.f32.mrb[21].mxu1 }
 0x455   : > { %2749 = vmatprep.mubr.msk.f32.mxu0 %vm1218_vm4, %v1616_v49 }
 0x456   : > { %2750 = vmatmul.mubr.msk.f32.gmra.mrb[16].mxu0 %vm1218_vm4, %v2717_v25 }
 0x457   : > { %v2720_v29 = vpop.f32.mrb[22].mxu1 }
 0x458   : > { %v1626_v1 = vpop.f32.mrb[23].mxu1 }
 0x459   : > { %2752 = vmatprep.mubr.msk.f32.mxu0 %vm1218_vm4, %v1626_v1 }
 0x45a   : > { %2753 = vmatmul.mubr.msk.f32.gmra.mrb[18].mxu0 %vm1218_vm4, %v2720_v29 }
 0x45b   : > { %v2723_v2 = vpop.f32.mrb[24].mxu1 }
 0x45c   : > { %v1636_v4 = vpop.f32.mrb[25].mxu1 }
 0x45d   : > { %2755 = vmatprep.mubr.msk.f32.mxu0 %vm1218_vm4, %v1636_v4 }
 0x45e   : > { %2756 = vmatmul.mubr.msk.f32.gmra.mrb[20].mxu0 %vm1218_vm4, %v2723_v2 }
 0x525   : > { %v2748_v9 = vpop.f32.mrb[14].mxu0 }
 0x526   : > { %v1900_v10 = vadd.f32 %v2748_v9, %v2511_v8  ;;  %v1854_v11 = vpop.f32.mrb[15].mxu0 }
 0x527   : > { %v1899_v12 = vadd.f32 %v2511_v8, %v1854_v11 }
 0x528   : > { %v1908_v15 = vmax.f32 %v1900_v10, 0.0 }
 0x529   : > { %v1907_v13 = vmax.f32 %v1899_v12, 0.0  ;;  %v2751_v14 = vpop.f32.mrb[16].mxu0 }
 0x52a   : > { %v1902_v17 = vadd.f32 %v2751_v14, %v2511_v8  ;;  %v1864_v18 = vpop.f32.mrb[17].mxu0 }
 0x52b   : > { %v1901_v19 = vadd.f32 %v2511_v8, %v1864_v18  ;;  %2766 = vmatprep.mubr.msk.f32.mxu1 %vm1218_vm4, %v1907_v13 }
 0x52c   : > { %2767 = vmatmul.mubr.msk.f32.vlgmr.msra.gmra.mrb[26].mxu1 %vm1218_vm4, %v1908_v15  ;;  %v1910_v21 = vmax.f32 %v1902_v17, 0.0 }
 0x52d   : > { %v1909_v22 = vmax.f32 %v1901_v19, 0.0  ;;  %v2754_v27 = vpop.f32.mrb[18].mxu0  ;;  %2827 = vmatpush3.bf16.msra.mxu1 %v2826_v20 }
 0x52e   : > { %v1904_v28 = vadd.f32 %v2754_v27, %v2511_v8  ;;  %v1874_v30 = vpop.f32.mrb[19].mxu0  ;;  %2828 = vmatprep.subr.bf16.mxu1 %v2960_v47 }
 0x52f   : > { %v1903_v34 = vadd.f32 %v2511_v8, %v1874_v30  ;;  %2769 = vmatprep.mubr.msk.f32.mxu1 %vm1218_vm4, %v1909_v22 }
 0x530   : > { %2770 = vmatmul.mubr.msk.f32.gmra.mrb[28].mxu1 %vm1218_vm4, %v1910_v21  ;;  %v1912_v38 = vmax.f32 %v1904_v28, 0.0 }
 0x531   : > { %v1911_v35 = vmax.f32 %v1903_v34, 0.0  ;;  %v2757_v36 = vpop.f32.mrb[20].mxu0  ;;  %2830 = vmatpush3.bf16.msra.mxu1 %v2829_v51 }
 0x532   : > { %v1906_v39 = vadd.f32 %v2757_v36, %v2511_v8  ;;  %v1884_v40 = vpop.f32.mrb[21].mxu0 }
 0x533   : > { %v1905_v42 = vadd.f32 %v2511_v8, %v1884_v40  ;;  %2772 = vmatprep.mubr.msk.f32.mxu1 %vm1218_vm4, %v1911_v35 }
 0x534   : > { %2773 = vmatmul.mubr.msk.f32.gmra.mrb[30].mxu1 %vm1218_vm4, %v1912_v38  ;;  %v1914_v43 = vmax.f32 %v1906_v39, 0.0 }
 0x535   : > { %v1913_v32 = vmax.f32 %v1905_v42, 0.0 }
 0x537   : > { %2775 = vmatprep.mubr.msk.f32.mxu1 %vm1218_vm4, %v1913_v32 }
 0x538   : > { %2776 = vmatmul.mubr.msk.f32.gmra.mrb[32].mxu1 %vm1218_vm4, %v1914_v43 }
 0x539   : > { %2786 = vmatprep.mubr.msk.f32.mxu1 %vm2961_vm0, %v2959_v24 }
 0x5ff   : > { %v2768_v54 = vpop.f32.mrb[26].mxu1 }
 0x600   : > { %v2017_v55 = vadd.f32 %v2768_v54, %v3393_v52  ;;  %v2011_v56 = vpop.f32.mrb[27].mxu1 }
 0x601   : > { %v2012_v3 = vadd.f32 %v3393_v52, %v2011_v56 }
 0x602   : > { %v2059_v16 = vcombine.high %v2017_v55, %v2017_v55  ;;  %v2088_v23 = vsel %vm1372_vm5, %v2017_v55, -inf }
 0x603   : > { %v2089_v57 = vrot.slane %v2088_v23, 4  ;;  %v2058_v53 = vcombine.high %v2012_v3, %v2012_v3  ;;  %v2074_v26 = vsel %vm1372_vm5, %v2012_v3, -inf  ;;  %v2771_v58 = vpop.f32.mrb[28].mxu1 }
 0x604   : > { %v2095_v24 = vsel %vm1372_vm5, %v2059_v16, -inf  ;;  %v2075_v59 = vrot.slane %v2074_v26, 4  ;;  %v2027_v31 = vadd.f32 %v2771_v58, %v3393_v52  ;;  %v2021_v60 = vpop.f32.mrb[29].mxu1 }
 0x605   : > { %v2090_v61 = vmax.f32 %v2088_v23, %v2089_v57  ;;  %v2096_v62 = vrot.slane %v2095_v24, 4  ;;  %v2081_v63 = vsel %vm1372_vm5, %v2058_v53, -inf  ;;  %v2022_v33 = vadd.f32 %v3393_v52, %v2021_v60 }
 0x606   : > { %v2076_v37 = vmax.f32 %v2074_v26, %v2075_v59  ;;  %v2082_v41 = vrot.slane %v2081_v63, 4  ;;  %v2061_v45 = vcombine.high %v2027_v31, %v2027_v31  ;;  %v2116_v0 = vsel %vm1372_vm5, %v2027_v31, -inf }
 0x607   : > { %v2091_v25 = vrot.slane %v2090_v61, 2  ;;  %v2097_v49 = vmax.f32 %v2095_v24, %v2096_v62  ;;  %v2117_v29 = vrot.slane %v2116_v0, 4  ;;  %v2060_v1 = vcombine.high %v2022_v33, %v2022_v33  ;;  %v2774_v2 = vpop.f32.mrb[30].mxu1 }
 0x608   : > { %v2077_v4 = vrot.slane %v2076_v37, 2  ;;  %v2083_v5 = vmax.f32 %v2081_v63, %v2082_v41  ;;  %v2123_v6 = vsel %vm1372_vm5, %v2061_v45, -inf  ;;  %v2102_v7 = vsel %vm1372_vm5, %v2022_v33, -inf  ;;  %v2031_v8 = vpop.f32.mrb[31].mxu1 }
 0x609   : > { %v2092_v9 = vmax.f32 %v2090_v61, %v2091_v25  ;;  %v2098_v10 = vrot.slane %v2097_v49, 2  ;;  %v2118_v11 = vmax.f32 %v2116_v0, %v2117_v29  ;;  %v2124_v12 = vrot.slane %v2123_v6, 4 }
 0x60a   : > { %v2078_v13 = vmax.f32 %v2076_v37, %v2077_v4  ;;  %v2084_v14 = vrot.slane %v2083_v5, 2  ;;  %v2103_v15 = vrot.slane %v2102_v7, 4  ;;  %v2109_v17 = vsel %vm1372_vm5, %v2060_v1, -inf }
 0x60b   : > { %v2093_v18 = vrot.slane %v2092_v9, 1  ;;  %v2099_v19 = vmax.f32 %v2097_v49, %v2098_v10  ;;  %v2119_v22 = vrot.slane %v2118_v11, 2  ;;  %v2125_v27 = vmax.f32 %v2123_v6, %v2124_v12  ;;  %v2777_v21 = vpop.f32.mrb[32].mxu1 }
 0x60c   : > { %v2079_v28 = vrot.slane %v2078_v13, 1  ;;  %v2085_v30 = vmax.f32 %v2083_v5, %v2084_v14  ;;  %v2104_v34 = vmax.f32 %v2102_v7, %v2103_v15  ;;  %v2110_v35 = vrot.slane %v2109_v17, 4  ;;  %v2041_v36 = vpop.f32.mrb[33].mxu1 }
 0x60d   : > { %v2094_v38 = vmax.f32 %v2092_v9, %v2093_v18  ;;  %v2100_v39 = vrot.slane %v2099_v19, 1  ;;  %v2120_v40 = vmax.f32 %v2118_v11, %v2119_v22  ;;  %v2126_v42 = vrot.slane %v2125_v27, 2 }
 0x60e   : > { %v2080_v32 = vmax.f32 %v2078_v13, %v2079_v28  ;;  %v2086_v43 = vrot.slane %v2085_v30, 1  ;;  %v2105_v44 = vrot.slane %v2104_v34, 2  ;;  %v2111_v46 = vmax.f32 %v2109_v17, %v2110_v35 }
 0x60f   : > { %v2101_v20 = vmax.f32 %v2099_v19, %v2100_v39  ;;  %v2188_v47 = vmax.f32 %v2094_v38, 0.0  ;;  %v2121_v48 = vrot.slane %v2120_v40, 1  ;;  %v2127_v50 = vmax.f32 %v2125_v27, %v2126_v42 }
 0x610   : > { %v2087_v51 = vmax.f32 %v2085_v30, %v2086_v43  ;;  %v2186_v54 = vmax.f32 %v2080_v32, 0.0  ;;  %v2106_v55 = vmax.f32 %v2104_v34, %v2105_v44  ;;  %v2112_v56 = vrot.slane %v2111_v46, 2 }
 0x611   : > { %v2189_v3 = vmax.f32 %v2101_v20, 0.0  ;;  %v3408_v16 = vsel %vm1218_vm4, %v2188_v47, -inf  ;;  %v2122_v23 = vmax.f32 %v2120_v40, %v2121_v48  ;;  %v2128_v57 = vrot.slane %v2127_v50, 1 }
 0x612   : > { %v2187_v53 = vmax.f32 %v2087_v51, 0.0  ;;  %v3411_v26 = vsel %vm1218_vm4, %v2186_v54, -inf  ;;  %v2107_v58 = vrot.slane %v2106_v55, 1  ;;  %v2113_v24 = vmax.f32 %v2111_v46, %v2112_v56 }
 0x613   : > { %v3414_v59 = vsel %vm1218_vm4, %v2189_v3, -inf  ;;  %v2129_v31 = vmax.f32 %v2127_v50, %v2128_v57  ;;  %v2192_v60 = vmax.f32 %v2122_v23, 0.0  ;;  %v2037_v61 = vadd.f32 %v2774_v2, %v3393_v52 }
 0x614   : > { %v3418_v62 = vsel %vm1218_vm4, %v2187_v53, -inf  ;;  %v2108_v63 = vmax.f32 %v2106_v55, %v2107_v58  ;;  %v2114_v33 = vrot.slane %v2113_v24, 1  ;;  %v2032_v37 = vadd.f32 %v3393_v52, %v2031_v8 }
 0x615   : > { %v2193_v41 = vmax.f32 %v2129_v31, 0.0  ;;  %v3422_v45 = vsel %vm1218_vm4, %v2192_v60, -inf  ;;  %v2063_v0 = vcombine.high %v2037_v61, %v2037_v61  ;;  %v2144_v25 = vsel %vm1372_vm5, %v2037_v61, -inf }
 0x616   : > { %v2211_v49 = vmax.f32 %v3408_v16, %v3422_v45  ;;  %v2115_v29 = vmax.f32 %v2113_v24, %v2114_v33  ;;  %v2190_v1 = vmax.f32 %v2108_v63, 0.0  ;;  %v2145_v2 = vrot.slane %v2144_v25, 4 }
 0x617   : > { %v3428_v4 = vsel %vm1218_vm4, %v2193_v41, -inf  ;;  %v2151_v5 = vsel %vm1372_vm5, %v2063_v0, -inf  ;;  %v2062_v6 = vcombine.high %v2032_v37, %v2032_v37  ;;  %v2130_v7 = vsel %vm1372_vm5, %v2032_v37, -inf }
 0x618   : > { %v2213_v8 = vmax.f32 %v3414_v59, %v3428_v4  ;;  %v2191_v9 = vmax.f32 %v2115_v29, 0.0  ;;  %v3435_v10 = vsel %vm1218_vm4, %v2190_v1, -inf  ;;  %v2146_v11 = vmax.f32 %v2144_v25, %v2145_v2 }
 0x619   : > { %v2207_v12 = vmax.f32 %v3411_v26, %v3435_v10  ;;  %v2152_v13 = vrot.slane %v2151_v5, 4  ;;  %v2131_v14 = vrot.slane %v2130_v7, 4  ;;  %v2137_v15 = vsel %vm1372_vm5, %v2062_v6, -inf }
 0x61a   : > { %v2208_v17 = vsel %vm1218_vm4, %v2191_v9, -inf  ;;  %v2147_v18 = vrot.slane %v2146_v11, 2  ;;  %v2138_v19 = vrot.slane %v2137_v15, 4  ;;  %v2047_v22 = vadd.f32 %v2777_v21, %v3393_v52 }
 0x61b   : > { %v2209_v27 = vmax.f32 %v3418_v62, %v2208_v17  ;;  %v2153_v28 = vmax.f32 %v2151_v5, %v2152_v13  ;;  %v2132_v30 = vmax.f32 %v2130_v7, %v2131_v14  ;;  %v2042_v34 = vadd.f32 %v3393_v52, %v2041_v36 }
 0x61c   : > { %v2148_v35 = vmax.f32 %v2146_v11, %v2147_v18  ;;  %v2139_v38 = vmax.f32 %v2137_v15, %v2138_v19  ;;  %v2065_v39 = vcombine.high %v2047_v22, %v2047_v22  ;;  %v2172_v40 = vsel %vm1372_vm5, %v2047_v22, -inf }
 0x61d   : > { %v2154_v42 = vrot.slane %v2153_v28, 2  ;;  %v2133_v32 = vrot.slane %v2132_v30, 2  ;;  %v2173_v43 = vrot.slane %v2172_v40, 4  ;;  %v2064_v44 = vcombine.high %v2042_v34, %v2042_v34 }
 0x61e   : > { %v2149_v46 = vrot.slane %v2148_v35, 1  ;;  %v2140_v20 = vrot.slane %v2139_v38, 2  ;;  %v2179_v47 = vsel %vm1372_vm5, %v2065_v39, -inf  ;;  %v2158_v21 = vsel %vm1372_vm5, %v2042_v34, -inf }
 0x61f   : > { %v2155_v48 = vmax.f32 %v2153_v28, %v2154_v42  ;;  %v2134_v50 = vmax.f32 %v2132_v30, %v2133_v32  ;;  %v2174_v51 = vmax.f32 %v2172_v40, %v2173_v43  ;;  %v2180_v54 = vrot.slane %v2179_v47, 4 }
 0x620   : > { %v2150_v52 = vmax.f32 %v2148_v35, %v2149_v46  ;;  %v2141_v36 = vmax.f32 %v2139_v38, %v2140_v20  ;;  %v2159_v55 = vrot.slane %v2158_v21, 4  ;;  %v2165_v56 = vsel %vm1372_vm5, %v2064_v44, -inf  ;;  %v2521_v20 = vld [vmem:[%s3524_s14] ss:$0 sm:$0xff] }
 0x621   : > { %v2156_v3 = vrot.slane %v2155_v48, 1  ;;  %v2135_v16 = vrot.slane %v2134_v50, 1  ;;  %v2175_v23 = vrot.slane %v2174_v51, 2  ;;  %v2181_v57 = vmax.f32 %v2179_v47, %v2180_v54 }
 0x622   : > { %v2196_v53 = vmax.f32 %v2150_v52, 0.0  ;;  %v2142_v26 = vrot.slane %v2141_v36, 1  ;;  %v2160_v58 = vmax.f32 %v2158_v21, %v2159_v55  ;;  %v2166_v24 = vrot.slane %v2165_v56, 4 }
 0x623   : > { %v2157_v31 = vmax.f32 %v2155_v48, %v2156_v3  ;;  %v2136_v60 = vmax.f32 %v2134_v50, %v2135_v16  ;;  %v2176_v61 = vmax.f32 %v2174_v51, %v2175_v23  ;;  %v2182_v62 = vrot.slane %v2181_v57, 2 }
 0x624   : > { %v2218_v63 = vsel %vm1218_vm4, %v2196_v53, -inf  ;;  %v2143_v33 = vmax.f32 %v2141_v36, %v2142_v26  ;;  %v2161_v37 = vrot.slane %v2160_v58, 2  ;;  %v2167_v41 = vmax.f32 %v2165_v56, %v2166_v24 }
 0x625   : > { %v2197_v45 = vmax.f32 %v2157_v31, 0.0  ;;  %v2219_v0 = vmax.f32 %v2211_v49, %v2218_v63  ;;  %v2194_v25 = vmax.f32 %v2136_v60, 0.0  ;;  %v2177_v29 = vrot.slane %v2176_v61, 1 }
 0x626   : > { %v2195_v1 = vmax.f32 %v2143_v33, 0.0  ;;  %v2183_v2 = vmax.f32 %v2181_v57, %v2182_v62  ;;  %v2162_v5 = vmax.f32 %v2160_v58, %v2161_v37  ;;  %v2168_v6 = vrot.slane %v2167_v41, 2 }
 0x627   : > { %v2220_v7 = vsel %vm1218_vm4, %v2197_v45, -inf  ;;  %v2214_v9 = vsel %vm1218_vm4, %v2194_v25, -inf  ;;  %v2178_v10 = vmax.f32 %v2176_v61, %v2177_v29 }
 0x628   : > { %v2221_v11 = vmax.f32 %v2213_v8, %v2220_v7  ;;  %v2215_v13 = vmax.f32 %v2207_v12, %v2214_v9  ;;  %v2216_v14 = vsel %vm1218_vm4, %v2195_v1, -inf  ;;  %v2184_v15 = vrot.slane %v2183_v2, 1 }
 0x629   : > { %v2217_v49 = vmax.f32 %v2209_v27, %v2216_v14  ;;  %v2200_v17 = vmax.f32 %v2178_v10, 0.0  ;;  %v2163_v18 = vrot.slane %v2162_v5, 1  ;;  %v2169_v19 = vmax.f32 %v2167_v41, %v2168_v6 }
 0x62a   : > { %v2185_v22 = vmax.f32 %v2183_v2, %v2184_v15 }
 0x62b   : > { %v2226_v28 = vsel %vm1218_vm4, %v2200_v17, -inf  ;;  %v2164_v30 = vmax.f32 %v2162_v5, %v2163_v18  ;;  %v2170_v34 = vrot.slane %v2169_v19, 1 }
 0x62c   : > { %v2201_v35 = vmax.f32 %v2185_v22, 0.0  ;;  %v2227_v38 = vmax.f32 %v2219_v0, %v2226_v28 }
 0x62d   : > { %v2171_v39 = vmax.f32 %v2169_v19, %v2170_v34  ;;  %v2198_v59 = vmax.f32 %v2164_v30, 0.0 }
 0x62e   : > { %v2228_v4 = vsel %vm1218_vm4, %v2201_v35, -inf }
 0x62f   : > { %v2229_v8 = vmax.f32 %v2221_v11, %v2228_v4  ;;  %v2199_v12 = vmax.f32 %v2171_v39, 0.0  ;;  %v2222_v27 = vsel %vm1218_vm4, %v2198_v59, -inf }
 0x630   : > { %v2223_v40 = vmax.f32 %v2215_v13, %v2222_v27 }
 0x631   : > { %v2231_v42 = vmax.f32 %v2227_v38, %v2229_v8  ;;  %v2224_v32 = vsel %vm1218_vm4, %v2199_v12, -inf }
 0x632   : > { %v2225_v43 = vmax.f32 %v2217_v49, %v2224_v32 }
 0x634   : > { %v2230_v44 = vmax.f32 %v2223_v40, %v2225_v43 }
 0x636   : > { %v2232_v46 = vmax.f32 %v2230_v44, %v2231_v42 }
 0x638   : > { %2787 = vmatmul.mubr.msk.f32.vlgmr.msra.gmra.mrb[34].mxu1 %vm1218_vm4, %v2232_v46 }
 0x70b   : > { %v2313_v47 = vpop.f32.mrb[34].mxu1 }
 0x70c   : > { %v2314_v21 = vadd.f32 %v2521_v20, %v2313_v47  ;;  %v2788_v48 = vpop.f32.mrb[35].mxu1 }
 0x70e   : > { %2317 = vst [vmem:[%s517_s30] sm:$0xff] %v2314_v21 }
 0x70f   : > { %2907 = shalt.err (!%p2904_p3)
}
 0x710   : > { %s2908_s27 = scalar_lea.hbm %s3468_s0, 128  ;;  %s2912_s20 = scalar_lea.hbm %s3525_s15, 256 }
 0x711   : > { %p2909_p4 = scmp.ne.s32.totalorder %s3468_s0, %s2908_s27  ;;  %p2913_p9 = scmp.lt.u32.totalorder %s3468_s0, %s3525_s15 }
 0x712   : > { %p2914_p10 = scmp.lt.u32.totalorder %s2912_s20, %s2908_s27  ;;  %p2916_p12 = scmp.lt.u32.totalorder %s2908_s27, %s3468_s0 }
 0x713   : > { %p2910_p7 = pnand %p2909_p4, %p3081_p5 }
 0x714   : > { %p2915_p11 = por %p2914_p10, %p2913_p9 }
 0x715   : > { %p2911_p8 = pneg %p2910_p7 }
 0x716   : > { %p2917_p13 = por %p2916_p12, %p2915_p11 }
 0x718   : > { %p2918_p0 = pnand %p2917_p13, %p2911_p8 }
 0x71a   : > { %2921 = shalt.err (!%p2918_p0)
}
 0x71b   : > { %2849 = dma.vmem_to_hbm [thread:$0]  (%p3081_p5), %s3470_s23, 128, %s3468_s0, %s2319_s1  }
 0x71c PF: > { %p2855_p1 = scmp.ge.s32.totalorder %s2956_s21, 2  ;;  %s2344_s17 = sand.u32 1, %s2944_s18  }
 0x71d   : > { %s2345_s16 = scalar_lea.sflag [#allocation3], %s2344_s17 }
 0x71e   : > { %p2852_p2 = pnand %p2855_p1, %p3085_p6 }
 0x720   : > { %2939 = dma.done.wait (!%p2852_p2), %s2345_s16, 128  }
 0x721   : > { %2941 = vsyncadd (!%p2852_p2), %s2345_s16, 4294967168  ;;  %s3538_s21 = sld [smem:[#allocation6_spill]]  ;;  %s3539_s25 = sld [smem:[#allocation5_spill]] }
 0x722   : > { %s3540_s20 = sld [smem:[#allocation7_spill]]  ;;  %s3541_s18 = smov %s2948_s19 }
 0x727   : > { %p25_p3 = scmp.ge.s32.totalorder %s3538_s21, 4   ;;  %s3542_s19 = smov %s3539_s25 }
 0x729   :  { %27 = sbr.rel (!%p25_p3) target bundleno = 6 (0x6), region = 121 }
 0x730   :  { %2350 = vsyncpa [#allocation3], 1 }
 0x731   :  { %2352 = vsyncpa [#allocation3 + $0x1], 1 }

</bundles_post_ra>
